<compile_context>
chip_gen: v6e
topology: v6e:2x2x1
jax: 0.10.0
libtpu: 0.0.40
codegen_flags: <defaults>
</compile_context>

<pallas_src>
import functools

import jax
import jax.numpy as jnp
from jax.experimental import pallas as pl
from jax.experimental.pallas import tpu as pltpu


def _round_up(x, m):
    return (x + m - 1) // m * m


def _dir_conv_kernel(S, H, x_ref, af_ref, ab_ref, w_ref, bf_ref, bb_ref, y_ref,
                     xpf_scr, xpb_scr, accf, accb):
    # x_ref:  (tk, S, C)  bf16   source-node tile
    # af/ab:  (tm, tk)    bf16   adjacency tiles A[dst_tile, src_tile]
    # w_ref:  (C, 2H)     bf16   fused [W_fwd | W_bwd]
    # bf/bb:  (1, S*H)    f32    per-direction bias tiled over S
    # y_ref:  (tm, S, 2H)        output tile
    k = pl.program_id(1)

    @pl.when(k == 0)
    def _init():
        # seed accumulators with the bias -> bias add is free
        accf[...] = jnp.broadcast_to(bf_ref[...], accf.shape)
        accb[...] = jnp.broadcast_to(bb_ref[...], accb.shape)

    # fused projection of this source tile: one (tk, C) @ (C, 2H) MXU pass per spatial slice,
    # halves written into lane-dense (tk, S*H) bf16 staging buffers (column = s*H + h).
    # NOTE: recomputed once per dst tile; cheap while C << tm.
    for s in range(S):
        xp = jnp.dot(x_ref[:, s, :], w_ref[...],
                     preferred_element_type=jnp.float32)              # (tk, 2H) f32
        xpf_scr[:, s * H:(s + 1) * H] = xp[:, :H].astype(xpf_scr.dtype)
        xpb_scr[:, s * H:(s + 1) * H] = xp[:, H:].astype(xpb_scr.dtype)

    # directional aggregation: lane axis spans S*H, reduce over source-node tiles (axis k)
    accf[...] += jnp.dot(af_ref[...], xpf_scr[...], preferred_element_type=jnp.float32)
    accb[...] += jnp.dot(ab_ref[...], xpb_scr[...], preferred_element_type=jnp.float32)

    @pl.when(k == pl.num_programs(1) - 1)
    def _store():
        # dir_aggr='cat': forward half -> channels [0, H), backward half -> [H, 2H)
        for s in range(S):
            y_ref[:, s, :H] = accf[:, s * H:(s + 1) * H].astype(y_ref.dtype)
            y_ref[:, s, H:] = accb[:, s * H:(s + 1) * H].astype(y_ref.dtype)


def feature_batch_spatial_dir_graph_conv(x, adj_f, adj_b, w_f, w_b, bias):
    """x: (N, S, C); adj_f/adj_b: (N, N) dense normalized A[target, source];
    w_f/w_b: (C, H); bias: (2H,).  Returns (N, S, 2H) = cat(fwd-aggr, bwd-aggr) + bias."""
    N, S, C = x.shape
    H = w_f.shape[1]
    out_dtype = x.dtype

    # --- tile sizes: single tile for small graphs; 256-aligned M / 128-aligned K for large N
    # (tm=256, tk=512 in bf16 keeps per-step VMEM well under the v7x 32 MiB scoped default) ---
    if N <= 512:
        n_pad = _round_up(N, 8)
        tm = tk = n_pad
    else:
        n_pad = _round_up(N, 512)
        tm, tk = 256, 512

    # pad nodes: padded source columns are zero in A (contribute nothing);
    # padded destination rows are sliced off below.
    if n_pad != N:
        p = n_pad - N
        x = jnp.pad(x, ((0, p), (0, 0), (0, 0)))
        adj_f = jnp.pad(adj_f, ((0, p), (0, p)))
        adj_b = jnp.pad(adj_b, ((0, p), (0, p)))

    # fused projection weight + bf16 MXU operands (accumulation stays f32 in-kernel)
    w_cat = jnp.concatenate([w_f, w_b], axis=1).astype(jnp.bfloat16)   # (C, 2H)
    x_bf = x.astype(jnp.bfloat16)
    af_bf = adj_f.astype(jnp.bfloat16)
    ab_bf = adj_b.astype(jnp.bfloat16)
    # per-direction bias tiled over S so it seeds the lane-dense (tm, S*H) accumulators
    b_f = jnp.tile(bias[:H].astype(jnp.float32), S).reshape(1, S * H)
    b_b = jnp.tile(bias[H:].astype(jnp.float32), S).reshape(1, S * H)

    grid = (n_pad // tm, n_pad // tk)
    kernel = functools.partial(_dir_conv_kernel, S, H)

    y = pl.pallas_call(
        kernel,
        out_shape=jax.ShapeDtypeStruct((n_pad, S, 2 * H), out_dtype),
        grid_spec=pltpu.PrefetchScalarGridSpec(
            num_scalar_prefetch=0,
            grid=grid,
            in_specs=[
                pl.BlockSpec((tk, S, C), lambda i, k: (k, 0, 0)),     # x source tile
                pl.BlockSpec((tm, tk), lambda i, k: (i, k)),          # A_forward tile
                pl.BlockSpec((tm, tk), lambda i, k: (i, k)),          # A_backward tile
                pl.BlockSpec((C, 2 * H), lambda i, k: (0, 0)),        # fused weights
                pl.BlockSpec((1, S * H), lambda i, k: (0, 0)),        # fwd bias (tiled)
                pl.BlockSpec((1, S * H), lambda i, k: (0, 0)),        # bwd bias (tiled)
            ],
            out_specs=pl.BlockSpec((tm, S, 2 * H), lambda i, k: (i, 0, 0)),
            scratch_shapes=[
                pltpu.VMEM((tk, S * H), jnp.bfloat16),   # projected fwd features of src tile
                pltpu.VMEM((tk, S * H), jnp.bfloat16),   # projected bwd features of src tile
                pltpu.VMEM((tm, S * H), jnp.float32),    # fwd accumulator (seeded with bias)
                pltpu.VMEM((tm, S * H), jnp.float32),    # bwd accumulator (seeded with bias)
            ],
        ),
        compiler_params=pltpu.CompilerParams(
            dimension_semantics=("parallel", "arbitrary")),
    )(x_bf, af_bf, ab_bf, w_cat, b_f, b_b)
    return y[:N]


def directed_norm_dense_adj(edge_index, n_nodes, add_self_loops=True):
    """Replicates directed_norm(flow='source_to_target') + the module's adj()/propagate
    indexing, returning dense forward/backward adjacencies A[target, source] (plain JAX:
    the scatter-based normalization is graph preprocessing, not part of the kernel)."""
    ei = edge_index
    ew = jnp.ones((ei.shape[1],), jnp.float32)
    if add_self_loops:
        src, dst = ei[0], ei[1]
        has_self = (jnp.zeros((n_nodes,), jnp.float32)
                    .at[src].add(jnp.where(src == dst, 1.0, 0.0))) > 0
        loop_idx = jnp.arange(n_nodes, dtype=ei.dtype)
        loops = jnp.stack([loop_idx, loop_idx])
        # add_remaining_self_loops: nodes that already have a self loop get a weight-0
        # extra loop (no-op) so shapes stay static; others get weight 1.
        loop_w = jnp.where(has_self, 0.0, 1.0)
        ei = jnp.concatenate([ei, loops], axis=1)
        ew = jnp.concatenate([ew, loop_w])
    col, row = ei[0], ei[1]                       # flow='source_to_target'
    in_deg = jnp.zeros((n_nodes,), jnp.float32).at[col].add(ew)
    out_deg = jnp.zeros((n_nodes,), jnp.float32).at[row].add(ew)
    in_inv = jnp.where(in_deg == 0, 0.0, 1.0 / jnp.sqrt(jnp.where(in_deg == 0, 1.0, in_deg)))
    out_inv = jnp.where(out_deg == 0, 0.0, 1.0 / jnp.sqrt(jnp.where(out_deg == 0, 1.0, out_deg)))
    w = out_inv[row] * ew * in_inv[col]
    # adj_forward: source=row, target=col  -> A_f[target, source] += w
    a_f = jnp.zeros((n_nodes, n_nodes), jnp.float32).at[col, row].add(w)
    # adj_backward: source=col, target=row -> transpose with identical weights
    a_b = jnp.zeros((n_nodes, n_nodes), jnp.float32).at[row, col].add(w)
    return a_f, a_b


if __name__ == "__main__":
    key = jax.random.PRNGKey(0)
    N, S, C_in, C_out = 16, 4, 8, 16     # nodes, spatial/feature-batch, in/out channels
    H = C_out // 2
    E = 32
    k1, k2, k3, k4, k5, k6 = jax.random.split(key, 6)

    src = jax.random.randint(k1, (E,), 0, N, dtype=jnp.int32)
    dst = (src + 1 + jax.random.randint(k2, (E,), 0, N - 1, dtype=jnp.int32)) % N  # no self loops
    edge_index = jnp.stack([src, dst])

    x = jax.random.normal(k3, (N, S, C_in), jnp.float32)
    # nn.Linear(in, H, bias=False).weight is (H, in); we store its transpose (in, H).
    w_f = 0.1 * jax.random.normal(k4, (C_in, H), jnp.float32)
    w_b = 0.1 * jax.random.normal(k5, (C_in, H), jnp.float32)
    # module initializes bias to zeros; use nonzero deterministic values to exercise the add path.
    bias = 0.1 * jax.random.normal(k6, (C_out,), jnp.float32)

    a_f, a_b = directed_norm_dense_adj(edge_index, N, add_self_loops=True)

    y = feature_batch_spatial_dir_graph_conv(x, a_f, a_b, w_f, w_b, bias)
    y = jax.block_until_ready(y)

    # plain-JAX f32 reference of the same forward semantics (kernel uses bf16 MXU operands
    # with f32 accumulation -> relaxed tolerance)
    xp_f = jnp.einsum("nsc,ch->nsh", x, w_f)
    xp_b = jnp.einsum("nsc,ch->nsh", x, w_b)
    ref = jnp.concatenate(
        [jnp.einsum("tn,nsh->tsh", a_f, xp_f),
         jnp.einsum("tn,nsh->tsh", a_b, xp_b)], axis=-1) + bias
    assert y.shape == ref.shape, "shape mismatch vs reference"
    assert jnp.allclose(y, ref, atol=3e-2, rtol=3e-2), "kernel mismatch vs reference"
    print("KERNEL_OK")
</pallas_src>

<mosaic_0001>
module attributes {stable_mosaic.version = 11 : i64} {
  func.func @_dir_conv_kernel(%arg0: i32, %arg1: i32, %arg2: memref<16x4x8xbf16, #tpu.memory_space<vmem>>, %arg3: memref<16x16xbf16, #tpu.memory_space<vmem>>, %arg4: memref<16x16xbf16, #tpu.memory_space<vmem>>, %arg5: memref<8x16xbf16, #tpu.memory_space<vmem>>, %arg6: memref<1x32xf32, #tpu.memory_space<vmem>>, %arg7: memref<1x32xf32, #tpu.memory_space<vmem>>, %arg8: memref<16x4x16xf32, #tpu.memory_space<vmem>>, %arg9: memref<16x32xbf16, #tpu.memory_space<vmem>>, %arg10: memref<16x32xbf16, #tpu.memory_space<vmem>>, %arg11: memref<16x32xf32, #tpu.memory_space<vmem>>, %arg12: memref<16x32xf32, #tpu.memory_space<vmem>>) attributes {dimension_semantics = [#tpu.dimension_semantics<parallel>, #tpu.dimension_semantics<arbitrary>], iteration_bounds = array<i64: 1, 1>, scalar_prefetch = 0 : i64, scratch_operands = 4 : i64, tpu.core_type = #tpu.core_type<tc>, window_params = [{transform_indices = @transform_0, window_bounds = array<i64: 16, 4, 8>}, {transform_indices = @transform_1, window_bounds = array<i64: 16, 16>}, {transform_indices = @transform_2, window_bounds = array<i64: 16, 16>}, {pipeline_mode = #tpu.pipeline_mode<synchronous>, transform_indices = @transform_3, window_bounds = array<i64: 8, 16>}, {pipeline_mode = #tpu.pipeline_mode<synchronous>, transform_indices = @transform_4, window_bounds = array<i64: 1, 32>}, {pipeline_mode = #tpu.pipeline_mode<synchronous>, transform_indices = @transform_5, window_bounds = array<i64: 1, 32>}, {transform_indices = @transform_6, window_bounds = array<i64: 16, 4, 16>}]} {
    %c0_i32 = arith.constant 0 : i32
    %0 = arith.cmpi eq, %arg1, %c0_i32 : i32
    %1 = arith.extui %0 : i1 to i32
    %c0_i32_0 = arith.constant 0 : i32
    %2 = arith.cmpi ne, %1, %c0_i32_0 : i32
    scf.if %2 {
      %c0_53 = arith.constant 0 : index
      %c0_54 = arith.constant 0 : index
      %58 = vector.load %arg6[%c0_53, %c0_54] : memref<1x32xf32, #tpu.memory_space<vmem>>, vector<1x32xf32>
      %59 = vector.shape_cast %58 : vector<1x32xf32> to vector<1x32xf32>
      %60 = vector.broadcast %59 : vector<1x32xf32> to vector<16x32xf32>
      %c0_55 = arith.constant 0 : index
      %c0_56 = arith.constant 0 : index
      %61 = vector.load %arg11[%c0_55, %c0_56] : memref<16x32xf32, #tpu.memory_space<vmem>>, vector<16x32xf32>
      tpu.vector_store %arg11[%c0_55, %c0_56], %60 {strides = array<i32>} : memref<16x32xf32, #tpu.memory_space<vmem>>, vector<16x32xf32>,
      %c0_57 = arith.constant 0 : index
      %c0_58 = arith.constant 0 : index
      %62 = vector.load %arg7[%c0_57, %c0_58] : memref<1x32xf32, #tpu.memory_space<vmem>>, vector<1x32xf32>
      %63 = vector.shape_cast %62 : vector<1x32xf32> to vector<1x32xf32>
      %64 = vector.broadcast %63 : vector<1x32xf32> to vector<16x32xf32>
      %c0_59 = arith.constant 0 : index
      %c0_60 = arith.constant 0 : index
      %65 = vector.load %arg12[%c0_59, %c0_60] : memref<16x32xf32, #tpu.memory_space<vmem>>, vector<16x32xf32>
      tpu.vector_store %arg12[%c0_59, %c0_60], %64 {strides = array<i32>} : memref<16x32xf32, #tpu.memory_space<vmem>>, vector<16x32xf32>,
    } else {
    }
    %c0 = arith.constant 0 : index
    %c0_1 = arith.constant 0 : index
    %c0_2 = arith.constant 0 : index
    %3 = vector.load %arg2[%c0, %c0_1, %c0_2] : memref<16x4x8xbf16, #tpu.memory_space<vmem>>, vector<16x1x8xbf16>
    %4 = vector.shape_cast %3 : vector<16x1x8xbf16> to vector<16x8xbf16>
    %c0_3 = arith.constant 0 : index
    %c0_4 = arith.constant 0 : index
    %5 = vector.load %arg5[%c0_3, %c0_4] : memref<8x16xbf16, #tpu.memory_space<vmem>>, vector<8x16xbf16>
    %cst = arith.constant dense<0.000000e+00> : vector<16x16xf32>
    %6 = tpu.matmul %4, %5, %cst {dimension_numbers = #tpu.dot_dimension_numbers<[1], [0], [0], [1], [0, 0, 1, 1], [], []>} : vector<16x8xbf16>, vector<8x16xbf16>, vector<16x16xf32> -> vector<16x16xf32>
    %7 = vector.extract_strided_slice %6 {offsets = [0, 0], sizes = [16, 8], strides = [1, 1]} : vector<16x16xf32> to vector<16x8xf32>
    %8 = arith.truncf %7 : vector<16x8xf32> to vector<16x8xbf16>
    %c0_5 = arith.constant 0 : index
    %c0_6 = arith.constant 0 : index
    %9 = vector.load %arg9[%c0_5, %c0_6] : memref<16x32xbf16, #tpu.memory_space<vmem>>, vector<16x8xbf16>
    tpu.vector_store %arg9[%c0_5, %c0_6], %8 {strides = array<i32>} : memref<16x32xbf16, #tpu.memory_space<vmem>>, vector<16x8xbf16>,
    %10 = vector.extract_strided_slice %6 {offsets = [0, 8], sizes = [16, 8], strides = [1, 1]} : vector<16x16xf32> to vector<16x8xf32>
    %11 = arith.truncf %10 : vector<16x8xf32> to vector<16x8xbf16>
    %c0_7 = arith.constant 0 : index
    %c0_8 = arith.constant 0 : index
    %12 = vector.load %arg10[%c0_7, %c0_8] : memref<16x32xbf16, #tpu.memory_space<vmem>>, vector<16x8xbf16>
    tpu.vector_store %arg10[%c0_7, %c0_8], %11 {strides = array<i32>} : memref<16x32xbf16, #tpu.memory_space<vmem>>, vector<16x8xbf16>,
    %c0_9 = arith.constant 0 : index
    %c1 = arith.constant 1 : index
    %c0_10 = arith.constant 0 : index
    %13 = vector.load %arg2[%c0_9, %c1, %c0_10] : memref<16x4x8xbf16, #tpu.memory_space<vmem>>, vector<16x1x8xbf16>
    %14 = vector.shape_cast %13 : vector<16x1x8xbf16> to vector<16x8xbf16>
    %c0_11 = arith.constant 0 : index
    %c0_12 = arith.constant 0 : index
    %15 = vector.load %arg5[%c0_11, %c0_12] : memref<8x16xbf16, #tpu.memory_space<vmem>>, vector<8x16xbf16>
    %cst_13 = arith.constant dense<0.000000e+00> : vector<16x16xf32>
    %16 = tpu.matmul %14, %15, %cst_13 {dimension_numbers = #tpu.dot_dimension_numbers<[1], [0], [0], [1], [0, 0, 1, 1], [], []>} : vector<16x8xbf16>, vector<8x16xbf16>, vector<16x16xf32> -> vector<16x16xf32>
    %17 = vector.extract_strided_slice %16 {offsets = [0, 0], sizes = [16, 8], strides = [1, 1]} : vector<16x16xf32> to vector<16x8xf32>
    %18 = arith.truncf %17 : vector<16x8xf32> to vector<16x8xbf16>
    %c0_14 = arith.constant 0 : index
    %c8 = arith.constant 8 : index
    %19 = vector.load %arg9[%c0_14, %c8] : memref<16x32xbf16, #tpu.memory_space<vmem>>, vector<16x8xbf16>
    tpu.vector_store %arg9[%c0_14, %c8], %18 {strides = array<i32>} : memref<16x32xbf16, #tpu.memory_space<vmem>>, vector<16x8xbf16>,
    %20 = vector.extract_strided_slice %16 {offsets = [0, 8], sizes = [16, 8], strides = [1, 1]} : vector<16x16xf32> to vector<16x8xf32>
    %21 = arith.truncf %20 : vector<16x8xf32> to vector<16x8xbf16>
    %c0_15 = arith.constant 0 : index
    %c8_16 = arith.constant 8 : index
    %22 = vector.load %arg10[%c0_15, %c8_16] : memref<16x32xbf16, #tpu.memory_space<vmem>>, vector<16x8xbf16>
    tpu.vector_store %arg10[%c0_15, %c8_16], %21 {strides = array<i32>} : memref<16x32xbf16, #tpu.memory_space<vmem>>, vector<16x8xbf16>,
    %c0_17 = arith.constant 0 : index
    %c2 = arith.constant 2 : index
    %c0_18 = arith.constant 0 : index
    %23 = vector.load %arg2[%c0_17, %c2, %c0_18] : memref<16x4x8xbf16, #tpu.memory_space<vmem>>, vector<16x1x8xbf16>
    %24 = vector.shape_cast %23 : vector<16x1x8xbf16> to vector<16x8xbf16>
    %c0_19 = arith.constant 0 : index
    %c0_20 = arith.constant 0 : index
    %25 = vector.load %arg5[%c0_19, %c0_20] : memref<8x16xbf16, #tpu.memory_space<vmem>>, vector<8x16xbf16>
    %cst_21 = arith.constant dense<0.000000e+00> : vector<16x16xf32>
    %26 = tpu.matmul %24, %25, %cst_21 {dimension_numbers = #tpu.dot_dimension_numbers<[1], [0], [0], [1], [0, 0, 1, 1], [], []>} : vector<16x8xbf16>, vector<8x16xbf16>, vector<16x16xf32> -> vector<16x16xf32>
    %27 = vector.extract_strided_slice %26 {offsets = [0, 0], sizes = [16, 8], strides = [1, 1]} : vector<16x16xf32> to vector<16x8xf32>
    %28 = arith.truncf %27 : vector<16x8xf32> to vector<16x8xbf16>
    %c0_22 = arith.constant 0 : index
    %c16 = arith.constant 16 : index
    %29 = vector.load %arg9[%c0_22, %c16] : memref<16x32xbf16, #tpu.memory_space<vmem>>, vector<16x8xbf16>
    tpu.vector_store %arg9[%c0_22, %c16], %28 {strides = array<i32>} : memref<16x32xbf16, #tpu.memory_space<vmem>>, vector<16x8xbf16>,
    %30 = vector.extract_strided_slice %26 {offsets = [0, 8], sizes = [16, 8], strides = [1, 1]} : vector<16x16xf32> to vector<16x8xf32>
    %31 = arith.truncf %30 : vector<16x8xf32> to vector<16x8xbf16>
    %c0_23 = arith.constant 0 : index
    %c16_24 = arith.constant 16 : index
    %32 = vector.load %arg10[%c0_23, %c16_24] : memref<16x32xbf16, #tpu.memory_space<vmem>>, vector<16x8xbf16>
    tpu.vector_store %arg10[%c0_23, %c16_24], %31 {strides = array<i32>} : memref<16x32xbf16, #tpu.memory_space<vmem>>, vector<16x8xbf16>,
    %c0_25 = arith.constant 0 : index
    %c3 = arith.constant 3 : index
    %c0_26 = arith.constant 0 : index
    %33 = vector.load %arg2[%c0_25, %c3, %c0_26] : memref<16x4x8xbf16, #tpu.memory_space<vmem>>, vector<16x1x8xbf16>
    %34 = vector.shape_cast %33 : vector<16x1x8xbf16> to vector<16x8xbf16>
    %c0_27 = arith.constant 0 : index
    %c0_28 = arith.constant 0 : index
    %35 = vector.load %arg5[%c0_27, %c0_28] : memref<8x16xbf16, #tpu.memory_space<vmem>>, vector<8x16xbf16>
    %cst_29 = arith.constant dense<0.000000e+00> : vector<16x16xf32>
    %36 = tpu.matmul %34, %35, %cst_29 {dimension_numbers = #tpu.dot_dimension_numbers<[1], [0], [0], [1], [0, 0, 1, 1], [], []>} : vector<16x8xbf16>, vector<8x16xbf16>, vector<16x16xf32> -> vector<16x16xf32>
    %37 = vector.extract_strided_slice %36 {offsets = [0, 0], sizes = [16, 8], strides = [1, 1]} : vector<16x16xf32> to vector<16x8xf32>
    %38 = arith.truncf %37 : vector<16x8xf32> to vector<16x8xbf16>
    %c0_30 = arith.constant 0 : index
    %c24 = arith.constant 24 : index
    %39 = vector.load %arg9[%c0_30, %c24] : memref<16x32xbf16, #tpu.memory_space<vmem>>, vector<16x8xbf16>
    tpu.vector_store %arg9[%c0_30, %c24], %38 {strides = array<i32>} : memref<16x32xbf16, #tpu.memory_space<vmem>>, vector<16x8xbf16>,
    %40 = vector.extract_strided_slice %36 {offsets = [0, 8], sizes = [16, 8], strides = [1, 1]} : vector<16x16xf32> to vector<16x8xf32>
    %41 = arith.truncf %40 : vector<16x8xf32> to vector<16x8xbf16>
    %c0_31 = arith.constant 0 : index
    %c24_32 = arith.constant 24 : index
    %42 = vector.load %arg10[%c0_31, %c24_32] : memref<16x32xbf16, #tpu.memory_space<vmem>>, vector<16x8xbf16>
    tpu.vector_store %arg10[%c0_31, %c24_32], %41 {strides = array<i32>} : memref<16x32xbf16, #tpu.memory_space<vmem>>, vector<16x8xbf16>,
    %c0_33 = arith.constant 0 : index
    %c0_34 = arith.constant 0 : index
    %43 = vector.load %arg11[%c0_33, %c0_34] : memref<16x32xf32, #tpu.memory_space<vmem>>, vector<16x32xf32>
    %c0_35 = arith.constant 0 : index
    %c0_36 = arith.constant 0 : index
    %44 = vector.load %arg3[%c0_35, %c0_36] : memref<16x16xbf16, #tpu.memory_space<vmem>>, vector<16x16xbf16>
    %c0_37 = arith.constant 0 : index
    %c0_38 = arith.constant 0 : index
    %45 = vector.load %arg9[%c0_37, %c0_38] : memref<16x32xbf16, #tpu.memory_space<vmem>>, vector<16x32xbf16>
    %cst_39 = arith.constant dense<0.000000e+00> : vector<16x32xf32>
    %46 = tpu.matmul %44, %45, %cst_39 {dimension_numbers = #tpu.dot_dimension_numbers<[1], [0], [0], [1], [0, 0, 1, 1], [], []>} : vector<16x16xbf16>, vector<16x32xbf16>, vector<16x32xf32> -> vector<16x32xf32>
    %47 = arith.addf %43, %46 : vector<16x32xf32>
    %c0_40 = arith.constant 0 : index
    %c0_41 = arith.constant 0 : index
    %48 = vector.load %arg11[%c0_40, %c0_41] : memref<16x32xf32, #tpu.memory_space<vmem>>, vector<16x32xf32>
    tpu.vector_store %arg11[%c0_40, %c0_41], %47 {strides = array<i32>} : memref<16x32xf32, #tpu.memory_space<vmem>>, vector<16x32xf32>,
    %c0_42 = arith.constant 0 : index
    %c0_43 = arith.constant 0 : index
    %49 = vector.load %arg12[%c0_42, %c0_43] : memref<16x32xf32, #tpu.memory_space<vmem>>, vector<16x32xf32>
    %c0_44 = arith.constant 0 : index
    %c0_45 = arith.constant 0 : index
    %50 = vector.load %arg4[%c0_44, %c0_45] : memref<16x16xbf16, #tpu.memory_space<vmem>>, vector<16x16xbf16>
    %c0_46 = arith.constant 0 : index
    %c0_47 = arith.constant 0 : index
    %51 = vector.load %arg10[%c0_46, %c0_47] : memref<16x32xbf16, #tpu.memory_space<vmem>>, vector<16x32xbf16>
    %cst_48 = arith.constant dense<0.000000e+00> : vector<16x32xf32>
    %52 = tpu.matmul %50, %51, %cst_48 {dimension_numbers = #tpu.dot_dimension_numbers<[1], [0], [0], [1], [0, 0, 1, 1], [], []>} : vector<16x16xbf16>, vector<16x32xbf16>, vector<16x32xf32> -> vector<16x32xf32>
    %53 = arith.addf %49, %52 : vector<16x32xf32>
    %c0_49 = arith.constant 0 : index
    %c0_50 = arith.constant 0 : index
    %54 = vector.load %arg12[%c0_49, %c0_50] : memref<16x32xf32, #tpu.memory_space<vmem>>, vector<16x32xf32>
    tpu.vector_store %arg12[%c0_49, %c0_50], %53 {strides = array<i32>} : memref<16x32xf32, #tpu.memory_space<vmem>>, vector<16x32xf32>,
    %c0_i32_51 = arith.constant 0 : i32
    %55 = arith.cmpi eq, %arg1, %c0_i32_51 : i32
    %56 = arith.extui %55 : i1 to i32
    %c0_i32_52 = arith.constant 0 : i32
    %57 = arith.cmpi ne, %56, %c0_i32_52 : i32
    scf.if %57 {
      %c0_53 = arith.constant 0 : index
      %c0_54 = arith.constant 0 : index
      %58 = vector.load %arg11[%c0_53, %c0_54] : memref<16x32xf32, #tpu.memory_space<vmem>>, vector<16x8xf32>
      %c0_55 = arith.constant 0 : index
      %c0_56 = arith.constant 0 : index
      %c0_57 = arith.constant 0 : index
      %59 = vector.load %arg8[%c0_55, %c0_56, %c0_57] : memref<16x4x16xf32, #tpu.memory_space<vmem>>, vector<16x1x8xf32>
      %60 = vector.shape_cast %59 : vector<16x1x8xf32> to vector<16x8xf32>
      %61 = vector.shape_cast %58 : vector<16x8xf32> to vector<16x1x8xf32>
      tpu.vector_store %arg8[%c0_55, %c0_56, %c0_57], %61 {strides = array<i32>} : memref<16x4x16xf32, #tpu.memory_space<vmem>>, vector<16x1x8xf32>,
      %c0_58 = arith.constant 0 : index
      %c0_59 = arith.constant 0 : index
      %62 = vector.load %arg12[%c0_58, %c0_59] : memref<16x32xf32, #tpu.memory_space<vmem>>, vector<16x8xf32>
      %c0_60 = arith.constant 0 : index
      %c0_61 = arith.constant 0 : index
      %c8_62 = arith.constant 8 : index
      %63 = vector.load %arg8[%c0_60, %c0_61, %c8_62] : memref<16x4x16xf32, #tpu.memory_space<vmem>>, vector<16x1x8xf32>
      %64 = vector.shape_cast %63 : vector<16x1x8xf32> to vector<16x8xf32>
      %65 = vector.shape_cast %62 : vector<16x8xf32> to vector<16x1x8xf32>
      tpu.vector_store %arg8[%c0_60, %c0_61, %c8_62], %65 {strides = array<i32>} : memref<16x4x16xf32, #tpu.memory_space<vmem>>, vector<16x1x8xf32>,
      %c0_63 = arith.constant 0 : index
      %c8_64 = arith.constant 8 : index
      %66 = vector.load %arg11[%c0_63, %c8_64] : memref<16x32xf32, #tpu.memory_space<vmem>>, vector<16x8xf32>
      %c0_65 = arith.constant 0 : index
      %c1_66 = arith.constant 1 : index
      %c0_67 = arith.constant 0 : index
      %67 = vector.load %arg8[%c0_65, %c1_66, %c0_67] : memref<16x4x16xf32, #tpu.memory_space<vmem>>, vector<16x1x8xf32>
      %68 = vector.shape_cast %67 : vector<16x1x8xf32> to vector<16x8xf32>
      %69 = vector.shape_cast %66 : vector<16x8xf32> to vector<16x1x8xf32>
      tpu.vector_store %arg8[%c0_65, %c1_66, %c0_67], %69 {strides = array<i32>} : memref<16x4x16xf32, #tpu.memory_space<vmem>>, vector<16x1x8xf32>,
      %c0_68 = arith.constant 0 : index
      %c8_69 = arith.constant 8 : index
      %70 = vector.load %arg12[%c0_68, %c8_69] : memref<16x32xf32, #tpu.memory_space<vmem>>, vector<16x8xf32>
      %c0_70 = arith.constant 0 : index
      %c1_71 = arith.constant 1 : index
      %c8_72 = arith.constant 8 : index
      %71 = vector.load %arg8[%c0_70, %c1_71, %c8_72] : memref<16x4x16xf32, #tpu.memory_space<vmem>>, vector<16x1x8xf32>
      %72 = vector.shape_cast %71 : vector<16x1x8xf32> to vector<16x8xf32>
      %73 = vector.shape_cast %70 : vector<16x8xf32> to vector<16x1x8xf32>
      tpu.vector_store %arg8[%c0_70, %c1_71, %c8_72], %73 {strides = array<i32>} : memref<16x4x16xf32, #tpu.memory_space<vmem>>, vector<16x1x8xf32>,
      %c0_73 = arith.constant 0 : index
      %c16_74 = arith.constant 16 : index
      %74 = vector.load %arg11[%c0_73, %c16_74] : memref<16x32xf32, #tpu.memory_space<vmem>>, vector<16x8xf32>
      %c0_75 = arith.constant 0 : index
      %c2_76 = arith.constant 2 : index
      %c0_77 = arith.constant 0 : index
      %75 = vector.load %arg8[%c0_75, %c2_76, %c0_77] : memref<16x4x16xf32, #tpu.memory_space<vmem>>, vector<16x1x8xf32>
      %76 = vector.shape_cast %75 : vector<16x1x8xf32> to vector<16x8xf32>
      %77 = vector.shape_cast %74 : vector<16x8xf32> to vector<16x1x8xf32>
      tpu.vector_store %arg8[%c0_75, %c2_76, %c0_77], %77 {strides = array<i32>} : memref<16x4x16xf32, #tpu.memory_space<vmem>>, vector<16x1x8xf32>,
      %c0_78 = arith.constant 0 : index
      %c16_79 = arith.constant 16 : index
      %78 = vector.load %arg12[%c0_78, %c16_79] : memref<16x32xf32, #tpu.memory_space<vmem>>, vector<16x8xf32>
      %c0_80 = arith.constant 0 : index
      %c2_81 = arith.constant 2 : index
      %c8_82 = arith.constant 8 : index
      %79 = vector.load %arg8[%c0_80, %c2_81, %c8_82] : memref<16x4x16xf32, #tpu.memory_space<vmem>>, vector<16x1x8xf32>
      %80 = vector.shape_cast %79 : vector<16x1x8xf32> to vector<16x8xf32>
      %81 = vector.shape_cast %78 : vector<16x8xf32> to vector<16x1x8xf32>
      tpu.vector_store %arg8[%c0_80, %c2_81, %c8_82], %81 {strides = array<i32>} : memref<16x4x16xf32, #tpu.memory_space<vmem>>, vector<16x1x8xf32>,
      %c0_83 = arith.constant 0 : index
      %c24_84 = arith.constant 24 : index
      %82 = vector.load %arg11[%c0_83, %c24_84] : memref<16x32xf32, #tpu.memory_space<vmem>>, vector<16x8xf32>
      %c0_85 = arith.constant 0 : index
      %c3_86 = arith.constant 3 : index
      %c0_87 = arith.constant 0 : index
      %83 = vector.load %arg8[%c0_85, %c3_86, %c0_87] : memref<16x4x16xf32, #tpu.memory_space<vmem>>, vector<16x1x8xf32>
      %84 = vector.shape_cast %83 : vector<16x1x8xf32> to vector<16x8xf32>
      %85 = vector.shape_cast %82 : vector<16x8xf32> to vector<16x1x8xf32>
      tpu.vector_store %arg8[%c0_85, %c3_86, %c0_87], %85 {strides = array<i32>} : memref<16x4x16xf32, #tpu.memory_space<vmem>>, vector<16x1x8xf32>,
      %c0_88 = arith.constant 0 : index
      %c24_89 = arith.constant 24 : index
      %86 = vector.load %arg12[%c0_88, %c24_89] : memref<16x32xf32, #tpu.memory_space<vmem>>, vector<16x8xf32>
      %c0_90 = arith.constant 0 : index
      %c3_91 = arith.constant 3 : index
      %c8_92 = arith.constant 8 : index
      %87 = vector.load %arg8[%c0_90, %c3_91, %c8_92] : memref<16x4x16xf32, #tpu.memory_space<vmem>>, vector<16x1x8xf32>
      %88 = vector.shape_cast %87 : vector<16x1x8xf32> to vector<16x8xf32>
      %89 = vector.shape_cast %86 : vector<16x8xf32> to vector<16x1x8xf32>
      tpu.vector_store %arg8[%c0_90, %c3_91, %c8_92], %89 {strides = array<i32>} : memref<16x4x16xf32, #tpu.memory_space<vmem>>, vector<16x1x8xf32>,
    } else {
    }
    return
  }
  func.func @transform_0(%arg0: i32, %arg1: i32) -> (i32, i32, i32) {
    %c0_i32 = arith.constant 0 : i32
    %c0_i32_0 = arith.constant 0 : i32
    %c0_i32_1 = arith.constant 0 : i32
    return %arg1, %c0_i32, %c0_i32_0 : i32, i32, i32
  }
  func.func @transform_1(%arg0: i32, %arg1: i32) -> (i32, i32) {
    %c0_i32 = arith.constant 0 : i32
    return %arg0, %arg1 : i32, i32
  }
  func.func @transform_2(%arg0: i32, %arg1: i32) -> (i32, i32) {
    %c0_i32 = arith.constant 0 : i32
    return %arg0, %arg1 : i32, i32
  }
  func.func @transform_3(%arg0: i32, %arg1: i32) -> (i32, i32) {
    %c0_i32 = arith.constant 0 : i32
    %c0_i32_0 = arith.constant 0 : i32
    %c0_i32_1 = arith.constant 0 : i32
    return %c0_i32, %c0_i32_0 : i32, i32
  }
  func.func @transform_4(%arg0: i32, %arg1: i32) -> (i32, i32) {
    %c0_i32 = arith.constant 0 : i32
    %c0_i32_0 = arith.constant 0 : i32
    %c0_i32_1 = arith.constant 0 : i32
    return %c0_i32, %c0_i32_0 : i32, i32
  }
  func.func @transform_5(%arg0: i32, %arg1: i32) -> (i32, i32) {
    %c0_i32 = arith.constant 0 : i32
    %c0_i32_0 = arith.constant 0 : i32
    %c0_i32_1 = arith.constant 0 : i32
    return %c0_i32, %c0_i32_0 : i32, i32
  }
  func.func @transform_6(%arg0: i32, %arg1: i32) -> (i32, i32, i32) {
    %c0_i32 = arith.constant 0 : i32
    %c0_i32_0 = arith.constant 0 : i32
    %c0_i32_1 = arith.constant 0 : i32
    return %arg0, %c0_i32, %c0_i32_0 : i32, i32, i32
  }
}

</mosaic_0001>

<bundles_post_ra>
// kernel: tpu_custom_call.1
= control target key start
LH: loop header
LB: loop body
LE: loop exit
PB: predicated region body
PF: predicated region fallthrough
CT: control target
= control target key end

     0   :  { %vm249_vm0 = vcmask 1043456   ;;  %v3070_v2 = vmov 0.0   ;;  %vm210_vm1 = vcmask 1041409   ;;  %vm3071_vm2 = vmmov 0   ;;  %s3799_s0 = inlined_call_operand.vmem [shape: bf16[16,4,8], index: 0, kind: input, shape index: {}]   ;;  %s3800_s1 = inlined_call_operand.vmem [shape: bf16[16,16], index: 1, kind: input, shape index: {}]   ;;  %s3801_s2 = inlined_call_operand.vmem [shape: bf16[16,16], index: 2, kind: input, shape index: {}]   ;;  %s3802_s3 = inlined_call_operand.vmem [shape: bf16[8,16], index: 3, kind: input, shape index: {}]   ;;  %s3803_s4 = inlined_call_operand.vmem [shape: f32[1,32], index: 4, kind: input, shape index: {}]   ;;  %s3804_s5 = inlined_call_operand.vmem [shape: f32[1,32], index: 5, kind: input, shape index: {}]   ;;  %s3805_s6 = inlined_call_operand.hbm [shape: f32[16,4,16], index: 6, kind: output, shape index: {}]  }
   0x1   :  { %v64_v0 = vld [vmem:[%s3802_s3] sm:$0xf]  ;;  %2994 = vmatprep.subr.bf16.mxu0 %v3070_v2  ;;  %3000 = vmatprep.subr.bf16.mxu1 %v3070_v2  ;;  %vm213_vm3 = vcmask 1042434   ;;  %vm216_vm4 = vcmask 1043459   ;;  %vm219_vm5 = vcmask 1044484   ;;  %vm222_vm6 = vcmask 1045509  }
   0x2   :  { %v329_v1 = vld [vmem:[%s3802_s3] sm:$0xf]  ;;  %v251_v3 = vsel %vm249_vm0, %v64_v0, 0  ;;  %2996 = vmatprep.mubr.msk.bf16.mxu0 %vm3071_vm2, %v3070_v2  ;;  %3002 = vmatprep.mubr.msk.bf16.mxu1 %vm3071_vm2, %v3070_v2  ;;  %vm225_vm7 = vcmask 1046534   ;;  %vm228_vm8 = vcmask 1047559   ;;  %vm245_vm9 = vcmask 64512  }
   0x3   :  { %v507_v4 = vsel %vm249_vm0, %v329_v1, 0  ;;  %2995 = vmatpush3.bf16.msra.mxu0 %v251_v3  ;;  %v2892_v5 = vld.sshfl [vmem:[%s3799_s0] sm:$0x1 pattern:$0x76325410] }
   0x4   :  { %3001 = vmatpush3.bf16.msra.mxu1 %v507_v4  ;;  %v2893_v6 = vld.sshfl [vmem:[%s3799_s0 + $0x2] sm:$0x1 pattern:$0x76325410]  ;;  %v193_v7 = vunpack.c.l.b16 %v2892_v5  ;;  %3006 = vmatprep.subr.bf16.mxu0 %v3070_v2 }
   0x5   :  { %v2894_v8 = vld.sshfl [vmem:[%s3799_s0 + $0x4] sm:$0x1 pattern:$0x76325410]  ;;  %v194_v9 = vunpack.c.l.b16 %v2893_v6  ;;  %3012 = vmatprep.subr.bf16.mxu1 %v3070_v2 }
   0x6   :  { %v2895_v10 = vld.sshfl [vmem:[%s3799_s0 + $0x6] sm:$0x1 pattern:$0x76325410]  ;;  %v195_v11 = vunpack.c.l.b16 %v2894_v8  ;;  %v474_v12 = vrot.slane %v193_v7, 1 }
   0x7   :  { %v2896_v13 = vld.sshfl [vmem:[%s3799_s0 + $0x8] sm:$0x1 pattern:$0x76325410]  ;;  %v196_v14 = vunpack.c.l.b16 %v2895_v10  ;;  %v209_v15 = vrot.slane %v194_v9, 7 }
   0x8   :  { %v2897_v16 = vld.sshfl [vmem:[%s3799_s0 + $0xa] sm:$0x1 pattern:$0x76325410]  ;;  %v197_v17 = vunpack.c.l.b16 %v2896_v13  ;;  %v212_v18 = vrot.slane %v195_v11, 6  ;;  %v475_v19 = vsel %vm210_vm1, %v194_v9, %v474_v12  ;;  %v476_v20 = vrot.slane %v195_v11, 7 }
   0x9   :  { %v2898_v21 = vld.sshfl [vmem:[%s3799_s0 + $0xc] sm:$0x1 pattern:$0x76325410]  ;;  %v198_v22 = vunpack.c.l.b16 %v2897_v16  ;;  %v211_v23 = vsel %vm210_vm1, %v209_v15, %v193_v7  ;;  %v215_v24 = vrot.slane %v196_v14, 5  ;;  %v478_v25 = vrot.slane %v196_v14, 6 }
   0xa   :  { %v2899_v26 = vld.sshfl [vmem:[%s3799_s0 + $0xe] sm:$0x1 pattern:$0x76325410]  ;;  %v199_v27 = vunpack.c.l.b16 %v2898_v21  ;;  %v214_v28 = vsel %vm213_vm3, %v212_v18, %v211_v23  ;;  %v218_v29 = vrot.slane %v197_v17, 4  ;;  %v477_v30 = vsel %vm213_vm3, %v476_v20, %v475_v19 }
   0xb   :  { %v2900_v31 = vld.sshfl [vmem:[%s3799_s0 + $0x10] sm:$0x1 pattern:$0x76325410]  ;;  %v200_v32 = vunpack.c.l.b16 %v2899_v26  ;;  %v217_v33 = vsel %vm216_vm4, %v215_v24, %v214_v28  ;;  %v221_v34 = vrot.slane %v198_v22, 3  ;;  %v479_v35 = vsel %vm216_vm4, %v478_v25, %v477_v30 }
   0xc   :  { %v2901_v36 = vld.sshfl [vmem:[%s3799_s0 + $0x12] sm:$0x1 pattern:$0x76325410]  ;;  %v201_v37 = vunpack.c.l.b16 %v2900_v31  ;;  %v220_v38 = vsel %vm219_vm5, %v218_v29, %v217_v33  ;;  %v224_v39 = vrot.slane %v199_v27, 2  ;;  %v480_v40 = vrot.slane %v197_v17, 5 }
   0xd   :  { %v2902_v41 = vld.sshfl [vmem:[%s3799_s0 + $0x14] sm:$0x1 pattern:$0x76325410]  ;;  %v202_v42 = vunpack.c.l.b16 %v2901_v36  ;;  %v223_v43 = vsel %vm222_vm6, %v221_v34, %v220_v38  ;;  %v227_v44 = vrot.slane %v200_v32, 1  ;;  %v482_v45 = vrot.slane %v198_v22, 4 }
   0xe   :  { %v2903_v46 = vld.sshfl [vmem:[%s3799_s0 + $0x16] sm:$0x1 pattern:$0x76325410]  ;;  %v203_v47 = vunpack.c.l.b16 %v2902_v41  ;;  %v226_v48 = vsel %vm225_vm7, %v224_v39, %v223_v43  ;;  %v481_v49 = vsel %vm219_vm5, %v480_v40, %v479_v35  ;;  %v484_v50 = vrot.slane %v199_v27, 3 }
   0xf   :  { %v2904_v51 = vld.sshfl [vmem:[%s3799_s0 + $0x18] sm:$0x1 pattern:$0x76325410]  ;;  %v204_v52 = vunpack.c.l.b16 %v2903_v46  ;;  %v230_v53 = vrot.slane %v202_v42, 7  ;;  %v483_v54 = vsel %vm222_vm6, %v482_v45, %v481_v49  ;;  %v229_v57 = vsel %vm228_vm8, %v227_v44, %v226_v48 }
  0x10   :  { %v2905_v55 = vld.sshfl [vmem:[%s3799_s0 + $0x1a] sm:$0x1 pattern:$0x76325410]  ;;  %v205_v56 = vunpack.c.l.b16 %v2904_v51  ;;  %v232_v58 = vrot.slane %v203_v47, 6  ;;  %v485_v59 = vsel %vm225_vm7, %v484_v50, %v483_v54  ;;  %v488_v0 = vrot.slane %v201_v37, 1 }
  0x11   :  { %v2906_v60 = vld.sshfl [vmem:[%s3799_s0 + $0x1c] sm:$0x1 pattern:$0x76325410]  ;;  %v206_v61 = vunpack.c.l.b16 %v2905_v55  ;;  %v231_v62 = vsel %vm210_vm1, %v230_v53, %v201_v37  ;;  %v234_v63 = vrot.slane %v204_v52, 5  ;;  %v486_v6 = vrot.slane %v200_v32, 2 }
  0x12   :  { %v2907_v1 = vld.sshfl [vmem:[%s3799_s0 + $0x1e] sm:$0x1 pattern:$0x76325410]  ;;  %v207_v3 = vunpack.c.l.b16 %v2906_v60  ;;  %v233_v4 = vsel %vm213_vm3, %v232_v58, %v231_v62  ;;  %v236_v5 = vrot.slane %v205_v56, 4  ;;  %v489_v10 = vsel %vm210_vm1, %v202_v42, %v488_v0 }
  0x13   :  { %v208_v7 = vunpack.c.l.b16 %v2907_v1  ;;  %v235_v8 = vsel %vm216_vm4, %v234_v63, %v233_v4  ;;  %v238_v9 = vrot.slane %v206_v61, 3  ;;  %v585_v11 = vld [vmem:[%s3802_s3] sm:$0xf]  ;;  %v490_v14 = vrot.slane %v203_v47, 7 }
  0x14   :  { %v237_v12 = vsel %vm219_vm5, %v236_v5, %v235_v8  ;;  %v240_v13 = vrot.slane %v207_v3, 2  ;;  %v492_v15 = vrot.slane %v204_v52, 6  ;;  %v494_v18 = vrot.slane %v205_v56, 5  ;;  %v845_v24 = vld [vmem:[%s3802_s3] sm:$0xf] }
  0x15   :  { %v239_v16 = vsel %vm222_vm6, %v238_v9, %v237_v12  ;;  %v242_v17 = vrot.slane %v208_v7, 1  ;;  %v496_v19 = vrot.slane %v206_v61, 4  ;;  %v491_v21 = vsel %vm213_vm3, %v490_v14, %v489_v10  ;;  %v2930_v25 = vld.sshfl [vmem:[%s3799_s0] sm:$0x2 pattern:$0x76325410] }
  0x16   :  { %v241_v20 = vsel %vm225_vm7, %v240_v13, %v239_v16  ;;  %v498_v22 = vrot.slane %v207_v3, 3  ;;  %v763_v23 = vsel %vm249_vm0, %v585_v11, 0  ;;  %v493_v27 = vsel %vm216_vm4, %v492_v15, %v491_v21  ;;  %v2931_v29 = vld.sshfl [vmem:[%s3799_s0 + $0x2] sm:$0x2 pattern:$0x76325410] }
  0x17   :  { %v243_v26 = vsel %vm228_vm8, %v242_v17, %v241_v20  ;;  %v500_v28 = vrot.slane %v208_v7, 2  ;;  %v714_v30 = vunpack.c.l.b16 %v2930_v25  ;;  %v487_v32 = vsel %vm228_vm8, %v486_v6, %v485_v59  ;;  %v2932_v34 = vld.sshfl [vmem:[%s3799_s0 + $0x4] sm:$0x2 pattern:$0x76325410] }
  0x18   :  { %v244_v31 = vpack.c.b16 %v243_v26, %v229_v57  ;;  %v495_v33 = vsel %vm219_vm5, %v494_v18, %v493_v27  ;;  %v715_v35 = vunpack.c.l.b16 %v2931_v29  ;;  %v2933_v37 = vld.sshfl [vmem:[%s3799_s0 + $0x6] sm:$0x2 pattern:$0x76325410]  ;;  %v716_v38 = vunpack.c.l.b16 %v2932_v34 }
  0x19   :  { %v497_v36 = vsel %vm222_vm6, %v496_v19, %v495_v33  ;;  %v730_v39 = vrot.slane %v714_v30, 2  ;;  %v990_v40 = vrot.slane %v714_v30, 3  ;;  %v2934_v42 = vld.sshfl [vmem:[%s3799_s0 + $0x8] sm:$0x2 pattern:$0x76325410]  ;;  %v717_v43 = vunpack.c.l.b16 %v2933_v37 }
  0x1a   :  { %2997 = vmatmul.mubr.msk.bf16.vlgmr.msra.gmra.mxu0 %vm245_vm9, %v244_v31  ;;  %v499_v41 = vsel %vm225_vm7, %v498_v22, %v497_v36  ;;  %v731_v44 = vrot.slane %v715_v35, 1  ;;  %v991_v45 = vrot.slane %v715_v35, 2  ;;  %v1023_v47 = vsel %vm249_vm0, %v845_v24, 0 }
  0x1b   :  { %v501_v46 = vsel %vm228_vm8, %v500_v28, %v499_v41  ;;  %3007 = vmatpush3.bf16.msra.mxu0 %v763_v23  ;;  %3008 = vmatprep.mubr.msk.bf16.mxu0 %vm3071_vm2, %v3070_v2  ;;  %v2935_v48 = vld.sshfl [vmem:[%s3799_s0 + $0xa] sm:$0x2 pattern:$0x76325410]  ;;  %v718_v49 = vunpack.c.l.b16 %v2934_v42  ;;  %v993_v50 = vrot.slane %v716_v38, 1  ;;  %v734_v55 = vrot.slane %v717_v43, 7 }
  0x1c   :  { %v502_v51 = vpack.c.b16 %v501_v46, %v487_v32  ;;  %v2936_v52 = vld.sshfl [vmem:[%s3799_s0 + $0xc] sm:$0x2 pattern:$0x76325410]  ;;  %v719_v53 = vunpack.c.l.b16 %v2935_v48  ;;  %v732_v54 = vsel %vm210_vm1, %v731_v44, %v730_v39  ;;  %3018 = vmatprep.subr.bf16.mxu0 %v3070_v2  ;;  %v992_v60 = vsel %vm210_vm1, %v991_v45, %v990_v40 }
  0x1d   :  { %v2937_v56 = vld.sshfl [vmem:[%s3799_s0 + $0xe] sm:$0x2 pattern:$0x76325410]  ;;  %v720_v57 = vunpack.c.l.b16 %v2936_v52  ;;  %v733_v58 = vsel %vm213_vm3, %v716_v38, %v732_v54  ;;  %v736_v59 = vrot.slane %v718_v49, 6  ;;  %v994_v1 = vsel %vm213_vm3, %v993_v50, %v992_v60 }
  0x1e   :  { %3003 = vmatmul.mubr.msk.bf16.vlgmr.msra.gmra.mxu1 %vm245_vm9, %v502_v51  ;;  %v2938_v61 = vld.sshfl [vmem:[%s3799_s0 + $0x10] sm:$0x2 pattern:$0x76325410]  ;;  %v721_v62 = vunpack.c.l.b16 %v2937_v56  ;;  %v735_v63 = vsel %vm216_vm4, %v734_v55, %v733_v58  ;;  %v738_v0 = vrot.slane %v719_v53, 5  ;;  %v995_v7 = vsel %vm216_vm4, %v717_v43, %v994_v1 }
  0x1f   :  { %3013 = vmatpush3.bf16.msra.mxu1 %v1023_v47  ;;  %v2939_v3 = vld.sshfl [vmem:[%s3799_s0 + $0x12] sm:$0x2 pattern:$0x76325410]  ;;  %v722_v4 = vunpack.c.l.b16 %v2938_v61  ;;  %v737_v5 = vsel %vm219_vm5, %v736_v59, %v735_v63  ;;  %v740_v6 = vrot.slane %v720_v57, 4  ;;  %3014 = vmatprep.mubr.msk.bf16.mxu1 %vm3071_vm2, %v3070_v2  ;;  %v996_v11 = vrot.slane %v718_v49, 7 }
  0x20   :  { %v2940_v8 = vld.sshfl [vmem:[%s3799_s0 + $0x14] sm:$0x2 pattern:$0x76325410]  ;;  %v723_v9 = vunpack.c.l.b16 %v2939_v3  ;;  %v739_v10 = vsel %vm222_vm6, %v738_v0, %v737_v5  ;;  %3024 = vmatprep.subr.bf16.mxu1 %v3070_v2  ;;  %v998_v15 = vrot.slane %v719_v53, 6  ;;  %v742_v23 = vrot.slane %v721_v62, 3 }
  0x21   :  { %v2941_v12 = vld.sshfl [vmem:[%s3799_s0 + $0x16] sm:$0x2 pattern:$0x76325410]  ;;  %v724_v13 = vunpack.c.l.b16 %v2940_v8  ;;  %v744_v14 = vrot.slane %v722_v4, 2  ;;  %v997_v19 = vsel %vm219_vm5, %v996_v11, %v995_v7  ;;  %v741_v22 = vsel %vm225_vm7, %v740_v6, %v739_v10 }
  0x22   :  { %v2942_v16 = vld.sshfl [vmem:[%s3799_s0 + $0x18] sm:$0x2 pattern:$0x76325410]  ;;  %v725_v17 = vunpack.c.l.b16 %v2941_v12  ;;  %v745_v18 = vrot.slane %v723_v9, 1  ;;  %v999_v28 = vsel %vm222_vm6, %v998_v15, %v997_v19  ;;  %v1004_v33 = vrot.slane %v722_v4, 3 }
  0x23   :  { %v2943_v20 = vld.sshfl [vmem:[%s3799_s0 + $0x1a] sm:$0x2 pattern:$0x76325410]  ;;  %v726_v21 = vunpack.c.l.b16 %v2942_v16  ;;  %v1000_v37 = vrot.slane %v720_v57, 5 }
  0x24   :  { %v2944_v24 = vld.sshfl [vmem:[%s3799_s0 + $0x1c] sm:$0x2 pattern:$0x76325410]  ;;  %v727_v25 = vunpack.c.l.b16 %v2943_v20  ;;  %v746_v26 = vsel %vm210_vm1, %v745_v18, %v744_v14  ;;  %v748_v27 = vrot.slane %v725_v17, 7 }
  0x25   :  { %v2945_v29 = vld.sshfl [vmem:[%s3799_s0 + $0x1e] sm:$0x2 pattern:$0x76325410]  ;;  %v728_v30 = vunpack.c.l.b16 %v2944_v24  ;;  %v747_v31 = vsel %vm213_vm3, %v724_v13, %v746_v26  ;;  %v750_v32 = vrot.slane %v726_v21, 6 }
  0x26   :  { %v729_v34 = vunpack.c.l.b16 %v2945_v29  ;;  %v749_v35 = vsel %vm216_vm4, %v748_v27, %v747_v31  ;;  %v752_v36 = vrot.slane %v727_v25, 5 }
  0x27   :  { %11 = vsyncpa [#allocation7], 0  ;;  %v751_v38 = vsel %vm219_vm5, %v750_v32, %v749_v35  ;;  %v754_v39 = vrot.slane %v728_v30, 4  ;;  %v1005_v40 = vrot.slane %v723_v9, 2  ;;  %v1007_v41 = vrot.slane %v724_v13, 1  ;;  %s3072_s0 = smov 120  }
  0x28   :  { %v743_v42 = vsel %vm228_vm8, %v742_v23, %v741_v22  ;;  %v753_v43 = vsel %vm222_vm6, %v752_v36, %v751_v38  ;;  %v756_v44 = vrot.slane %v729_v34, 3  ;;  %v1010_v45 = vrot.slane %v726_v21, 7  ;;  %s3073_s19 = smov 8   ;;  %s3074_s20 = smov 16   ;;  %v2891_v23 = vld [vmem:[%s3804_s5] ss:$0 sm:$0xff] }
  0x29   :  { %v755_v46 = vsel %vm225_vm7, %v754_v39, %v753_v43  ;;  %v1002_v47 = vrot.slane %v721_v62, 4  ;;  %v1006_v48 = vsel %vm210_vm1, %v1005_v40, %v1004_v33  ;;  %v1012_v49 = vrot.slane %v727_v25, 6  ;;  %s3075_s21 = smov 24   ;;  %v3044_v39 = vld [vmem:[%s3801_s2] sm:$0xff]   ;;  %s3078_s2 = smov 104  }
  0x2a   :  { %v757_v50 = vsel %vm228_vm8, %v756_v44, %v755_v46  ;;  %v1001_v51 = vsel %vm225_vm7, %v1000_v37, %v999_v28  ;;  %v1008_v52 = vsel %vm213_vm3, %v1007_v41, %v1006_v48  ;;  %v1014_v53 = vrot.slane %v728_v30, 5  ;;  %v3045_v37 = vld [vmem:[%s3800_s1] sm:$0xff]   ;;  %s3077_s1 = smov 112  }
  0x2b   :  { %v758_v54 = vpack.c.b16 %v757_v50, %v743_v42  ;;  %v1009_v55 = vsel %vm216_vm4, %v725_v17, %v1008_v52  ;;  %v1016_v56 = vrot.slane %v729_v34, 4  ;;  %v1003_v58 = vsel %vm228_vm8, %v1002_v47, %v1001_v51  ;;  %v2890_v40 = vld [vmem:[%s3803_s4] ss:$0 sm:$0xff]  ;;  %s3079_s4 = smov [#allocation6]  }
  0x2c   :  { %v1011_v57 = vsel %vm219_vm5, %v1010_v45, %v1009_v55  ;;  %vm302_vm10 = vcmask 60416   ;;  %vm36_vm11 = vcmask 261120   ;;  %vm562_vm12 = vcmask 126016   ;;  %s2879_s29 = sshll.u32 %s3079_s4, 4  ;;  %s2880_s29 = int_to_ptr.vmem [resolvable:$true] %s2879_s29 }
  0x2d   :  { %3009 = vmatmul.mubr.msk.bf16.vlgmr.msra.gmra.mxu0 %vm245_vm9, %v758_v54  ;;  %v1013_v59 = vsel %vm222_vm6, %v1012_v49, %v1011_v57  ;;  %46 = vst.msk [vmem:[#allocation5] sm:$0xff] %vm36_vm11, %v2891_v23  ;;  %47 = vst.msk [vmem:[#allocation5 + $0x8] sm:$0xff] %vm36_vm11, %v2891_v23  ;;  %vm818_vm13 = vcmask 191616   ;;  %vm1078_vm14 = vcmask 257216   ;;  %vm1106_vm15 = vcmask 130048   ;;  %s3048_s30 = scalar_lea.vmem %s2880_s29, 1024  ;;  %p3053_p1 = scmp.lt.s32.totalorder %s2880_s29, %s2880_s29 }
  0x2e   :  { %v1015_v60 = vsel %vm225_vm7, %v1014_v53, %v1013_v59  ;;  %3020 = vmatprep.mubr.msk.bf16.mxu0 %vm3071_vm2, %v3070_v2  ;;  %37 = vst.msk [vmem:[#allocation4] sm:$0xff] %vm36_vm11, %v2890_v40  ;;  %38 = vst.msk [vmem:[#allocation4 + $0x8] sm:$0xff] %vm36_vm11, %v2890_v40  ;;  %v3076_v44 = vmov 1966171168   ;;  %v1232_v46 = vlaneseq  ;;  %vm1342_vm0 = vcmask 57344   ;;  %p3049_p0 = scmp.ne.s32.totalorder %s2880_s29, %s3048_s30  ;;  %p3054_p2 = scmp.lt.s32.totalorder %s3048_s30, %s3048_s30 }
  0x2f   :  { %v1017_v61 = vsel %vm228_vm8, %v1016_v56, %v1015_v60  ;;  %v1230_v45 = vunpack.c.l.s4 %v3076_v44  ;;  %vm1573_vm1 = vcmask 122944  }
  0x30   :  { %v1018_v62 = vpack.c.b16 %v1017_v61, %v1003_v58  ;;  %v1233_v55 = vshrl.u32 %v1232_v46, 7  ;;  %p3055_p3 = por %p3054_p2, %p3053_p1 }
  0x31   :  { %v1231_v54 = vunpack.c.0.s8 %v1230_v45 }
  0x32   :  { %3015 = vmatmul.mubr.msk.bf16.vlgmr.msra.gmra.mxu1 %vm245_vm9, %v1018_v62  ;;  %p3056_p4 = pnand %p3055_p3, %p3049_p0 }
  0x33   :  { %3026 = vmatprep.mubr.msk.bf16.mxu1 %vm3071_vm2, %v3070_v2  ;;  %v3336_v61 = vsub.s32 %v1231_v54, %v1233_v55 }
  0x34   :  { %v1156_v47 = vld [vmem:[#allocation5] sm:$0xff]  ;;  %v1157_v57 = vld [vmem:[#allocation5 + $0x8] sm:$0xff] }
  0x35   :  { %v1089_v41 = vld [vmem:[#allocation4] sm:$0xff]  ;;  %v1090_v49 = vld [vmem:[#allocation4 + $0x8] sm:$0xff] }
  0xda   :  { %v287_v63 = vpop.f32.mrf.mxu0 }
  0xdb   :  { %v2974_v0 = vpack.c.bf16 %v287_v63, %v287_v63 }
  0xdc   :  { %v2998_v1 = vpop.f32.mrf.mxu0 }
  0xdd   :  { %303 = vst.msk [vmem:[#allocation2] sm:$0xf] %vm302_vm10, %v2974_v0  ;;  %305 = vrot.lane.b32.xlu0 %v2974_v0, %s3072_s0 }
  0xde   :  { %v543_v3 = vpop.f32.mrf.mxu1  ;;  %v290_v4 = vpop.f32.mrf.mxu0 }
  0xdf   :  { %v2976_v5 = vpack.c.bf16 %v543_v3, %v543_v3  ;;  %v2975_v6 = vpack.c.bf16 %v290_v4, %v290_v4 }
  0xe0   :  { %v3004_v7 = vpop.f32.mrf.mxu1  ;;  %v2999_v8 = vpop.f32.mrf.mxu0 }
  0xe1   :  { %556 = vrot.lane.b32.xlu1 %v2976_v5, %s3073_s19  ;;  %304 = vst.msk [vmem:[#allocation2 + $0x4] sm:$0xf] %vm302_vm10, %v2975_v6  ;;  %307 = vrot.lane.b32.xlu0 %v2975_v6, %s3072_s0  ;;  %v3346_v8 = vsub.s32 0, %v1233_v55 }
  0xe2   :  { %v546_v2 = vpop.f32.mrf.mxu1 }
  0xe3   :  { %v2977_v9 = vpack.c.bf16 %v546_v2, %v546_v2 }
  0xe4   :  { %v3005_v10 = vpop.f32.mrf.mxu1 }
  0xe5   :  { %558 = vrot.lane.b32.xlu1 %v2977_v9, %s3073_s19 }
  0xed   :  { %v799_v11 = vpop.f32.mrf.mxu0 }
  0xee   :  { %v2978_v12 = vpack.c.bf16 %v799_v11, %v799_v11 }
  0xef   :  { %v3010_v13 = vpop.f32.mrf.mxu0 }
  0xf0   :  { %812 = vrot.lane.b32.xlu0 %v2978_v12, %s3074_s20 }
  0xf1   :  { %v802_v14 = vpop.f32.mrf.mxu0 }
  0xf2   :  { %v1059_v15 = vpop.f32.mrf.mxu1  ;;  %v2979_v16 = vpack.c.bf16 %v802_v14, %v802_v14 }
  0xf3   :  { %v3011_v17 = vpop.f32.mrf.mxu0  ;;  %v2980_v18 = vpack.c.bf16 %v1059_v15, %v1059_v15 }
  0xf4   :  { %v3016_v19 = vpop.f32.mrf.mxu1  ;;  %821 = vrot.lane.b32.xlu0 %v2978_v12, %s3073_s19  ;;  %814 = vrot.lane.b32.xlu1 %v2979_v16, %s3074_s20 }
  0xf6   :  { %v1062_v20 = vpop.f32.mrf.mxu1 }
  0xf7   :  { %v2981_v22 = vpack.c.bf16 %v1062_v20, %v1062_v20 }
  0xf8   :  { %v3017_v21 = vpop.f32.mrf.mxu1  ;;  %1072 = vrot.lane.b32.xlu0 %v2980_v18, %s3075_s21  ;;  %823 = vrot.lane.b32.xlu1 %v2979_v16, %s3073_s19 }
  0xfc   :  { %1081 = vrot.lane.b32.xlu0 %v2980_v18, %s3074_s20  ;;  %1074 = vrot.lane.b32.xlu1 %v2981_v22, %s3075_s21 }
 0x100   :  { %1083 = vrot.lane.b32.xlu1 %v2981_v22, %s3074_s20 }
 0x14f   :  { %v306_v24 = vpop.permute.xlu0 %305 }
 0x150   :  { %311 = vst.msk [vmem:[#allocation3] sm:$0xf] %vm302_vm10, %v306_v24 }
 0x151   :  { %567 = vst.msk [vmem:[#allocation3] sm:$0xf] %vm562_vm12, %v2976_v5 }
 0x153   :  { %v557_v25 = vpop.permute.xlu1 %556  ;;  %v308_v26 = vpop.permute.xlu0 %307 }
 0x154   :  { %563 = vst.msk [vmem:[#allocation2] sm:$0xf] %vm562_vm12, %v557_v25 }
 0x155   :  { %312 = vst.msk [vmem:[#allocation3 + $0x4] sm:$0xf] %vm302_vm10, %v308_v26 }
 0x156   :  { %568 = vst.msk [vmem:[#allocation3 + $0x4] sm:$0xf] %vm562_vm12, %v2977_v9 }
 0x157   :  { %v559_v27 = vpop.permute.xlu1 %558 }
 0x158   :  { %564 = vst.msk [vmem:[#allocation2 + $0x4] sm:$0xf] %vm562_vm12, %v559_v27 }
 0x162   :  { %v813_v28 = vpop.permute.xlu0 %812 }
 0x163   :  { %819 = vst.msk [vmem:[#allocation2] sm:$0xf] %vm818_vm13, %v813_v28 }
 0x166   :  { %v822_v29 = vpop.permute.xlu0 %821  ;;  %v815_v30 = vpop.permute.xlu1 %814 }
 0x167   :  { %827 = vst.msk [vmem:[#allocation3] sm:$0xf] %vm818_vm13, %v822_v29  ;;  %820 = vst.msk [vmem:[#allocation2 + $0x4] sm:$0xf] %vm818_vm13, %v815_v30 }
 0x16a   :  { %v1073_v31 = vpop.permute.xlu0 %1072  ;;  %v824_v32 = vpop.permute.xlu1 %823 }
 0x16b   :  { %1079 = vst.msk [vmem:[#allocation2] sm:$0xf] %vm1078_vm14, %v1073_v31 }
 0x16c   :  { %828 = vst.msk [vmem:[#allocation3 + $0x4] sm:$0xf] %vm818_vm13, %v824_v32 }
 0x16e   :  { %v1082_v33 = vpop.permute.xlu0 %1081  ;;  %v1075_v34 = vpop.permute.xlu1 %1074 }
 0x16f   :  { %1087 = vst.msk [vmem:[#allocation3] sm:$0xf] %vm1078_vm14, %v1082_v33  ;;  %1080 = vst.msk [vmem:[#allocation2 + $0x4] sm:$0xf] %vm1078_vm14, %v1075_v34 }
 0x172   :  { %v1084_v35 = vpop.permute.xlu1 %1083 }
 0x173   :  { %1088 = vst.msk [vmem:[#allocation3 + $0x4] sm:$0xf] %vm1078_vm14, %v1084_v35 }
 0x176   :  { %v3042_v36 = vld [vmem:[#allocation2] sm:$0xff]  }
 0x177   :  { %3019 = vmatpush3.bf16.msra.mxu0 %v3042_v36 }
 0x17a   :  { %v3043_v38 = vld [vmem:[#allocation3] sm:$0xff]   ;;  %3021 = vmatmul.mubr.msk.bf16.vlgmr.msra.gmra.mxu0 %vm1106_vm15, %v3045_v37 }
 0x17b   :  { %3025 = vmatpush3.bf16.msra.mxu1 %v3043_v38 }
 0x17e   :  { %3027 = vmatmul.mubr.msk.bf16.vlgmr.msra.gmra.mxu1 %vm1106_vm15, %v3044_v39 }
 0x23a   :  { %v1144_v42 = vpop.f32.mrf.mxu0 }
 0x23b   :  { %v1151_v43 = vadd.f32 %v1144_v42, %v1089_v41 }
 0x23c   :  { %v3022_v48 = vpop.f32.mrf.mxu0 }
 0x23d   :  { %1154 = vst.msk [vmem:[#allocation4] sm:$0xff] %vm36_vm11, %v1151_v43 }
 0x23e   :  { %v1210_v50 = vpop.f32.mrf.mxu1  ;;  %v1147_v51 = vpop.f32.mrf.mxu0 }
 0x23f   :  { %v1217_v52 = vadd.f32 %v1210_v50, %v1156_v47  ;;  %v1152_v53 = vadd.f32 %v1147_v51, %v1090_v49 }
 0x240   :  { %v3028_v56 = vpop.f32.mrf.mxu1  ;;  %v3023_v58 = vpop.f32.mrf.mxu0 }
 0x241   :  { %1219 = vst.msk [vmem:[#allocation5] sm:$0xff] %vm36_vm11, %v1217_v52  ;;  %1155 = vst.msk [vmem:[#allocation4 + $0x8] sm:$0xff] %vm36_vm11, %v1152_v53 }
 0x242   :  { %v1213_v59 = vpop.f32.mrf.mxu1 }
 0x243   :  { %v1218_v60 = vadd.f32 %v1213_v59, %v1157_v57 }
 0x244   :  { %v3029_v62 = vpop.f32.mrf.mxu1  ;;  %v1590_v63 = vld [vmem:[#allocation4] sm:$0xff] }
 0x245   :  { %1220 = vst.msk [vmem:[#allocation5 + $0x8] sm:$0xff] %vm36_vm11, %v1218_v60  ;;  %v1601_v0 = vrot.slane %v1590_v63, %v3336_v61  ;;  %v1594_v1 = vcombine.high %v1590_v63, %v1590_v63 }
 0x247   :  { %v1617_v3 = vrot.slane %v1601_v0, %v3336_v61  ;;  %v1609_v4 = vcombine.high %v1601_v0, %v1601_v0  ;;  %v1608_v5 = vrot.slane %v1594_v1, %v3336_v61 }
 0x248   :  { %v3342_v6 = vld [vmem:[#allocation5] sm:$0xff]  ;;  %v1591_v12 = vld [vmem:[#allocation4 + $0x8] sm:$0xff] }
 0x249   :  { %v1370_v7 = vrot.slane %v3342_v6, %v3336_v61  ;;  %v1631_v2 = vrot.slane %v1609_v4, %v3336_v61  ;;  %1343 = vst.msk [vmem:[#allocation6] sm:$0x1] %vm1342_vm0, %v1617_v3  ;;  %v3350_v9 = vcombine.high %v1617_v3, %v1617_v3  ;;  %v3353_v10 = vrot.slane %v1608_v5, %v3336_v61 }
 0x24a   :  { %v1610_v11 = vcombine.high %v1608_v5, %v1608_v5  ;;  %v1650_v19 = vrot.slane %v1591_v12, %v3336_v61  ;;  %v1695_v21 = vrot.slane %v1617_v3, %v3346_v8  ;;  %v1643_v31 = vcombine.high %v1591_v12, %v1591_v12 }
 0x24b   :  { %v3356_v13 = vrot.slane %v1370_v7, %v3336_v61  ;;  %v1378_v14 = vcombine.high %v1370_v7, %v1370_v7  ;;  %1344 = vst.msk [vmem:[#allocation6 + $0x4] sm:$0x1] %vm1342_vm0, %v1631_v2  ;;  %v3359_v15 = vcombine.high %v1631_v2, %v1631_v2  ;;  %1345 = vst.msk [vmem:[#allocation6 + $0x8] sm:$0x1] %vm1342_vm0, %v3350_v9 }
 0x24c   :  { %v3362_v16 = vrot.slane %v1610_v11, %v3336_v61  ;;  %1347 = vst.msk [vmem:[#allocation6 + $0x10] sm:$0x1] %vm1342_vm0, %v3353_v10  ;;  %v1699_v22 = vrot.slane %v1631_v2, %v3346_v8  ;;  %v1640_v23 = vcombine.high %v3353_v10, %v3353_v10  ;;  %v1666_v25 = vrot.slane %v1650_v19, %v3336_v61  ;;  %v1360_v63 = vld [vmem:[#allocation5 + $0x8] sm:$0xff] }
 0x24d   :  { %v1464_v17 = vrot.slane %v3356_v13, %v3346_v8  ;;  %v3371_v18 = vrot.slane %v1378_v14, %v3336_v61  ;;  %1346 = vst.msk [vmem:[#allocation6 + $0xc] sm:$0x1] %vm1342_vm0, %v3359_v15  ;;  %v1658_v29 = vcombine.high %v1650_v19, %v1650_v19  ;;  %v1657_v34 = vrot.slane %v1643_v31, %v3336_v61 }
 0x24e   :  { %1348 = vst.msk [vmem:[#allocation6 + $0x14] sm:$0x1] %vm1342_vm0, %v3362_v16  ;;  %v1642_v24 = vcombine.high %v3362_v16, %v3362_v16  ;;  %v3391_v26 = vrot.slane %v1640_v23, %v3346_v8  ;;  %v3397_v28 = vrot.slane %v1666_v25, %v3346_v8  ;;  %1349 = vst.msk [vmem:[#allocation6 + $0x18] sm:$0x1] %vm1342_vm0, %v1640_v23 }
 0x24f   :  { %1525 = vrot.lane.b32.xlu0 %v1464_v17, %s3073_s19  ;;  %v1468_v20 = vrot.slane %v3371_v18, %v3346_v8  ;;  %1351 = vst.msk [vmem:[#allocation6 + $0x20] sm:$0x1] %vm1342_vm0, %v1666_v25  ;;  %v1688_v30 = vcombine.high %v1666_v25, %v1666_v25  ;;  %v1680_v32 = vrot.slane %v1658_v29, %v3336_v61 }
 0x250   :  { %v3394_v27 = vrot.slane %v1642_v24, %v3346_v8  ;;  %1350 = vst.msk [vmem:[#allocation6 + $0x1c] sm:$0x1] %vm1342_vm0, %v1642_v24  ;;  %v1673_v37 = vrot.slane %v1657_v34, %v3336_v61  ;;  %v1659_v38 = vcombine.high %v1657_v34, %v1657_v34  ;;  %v1363_v40 = vcombine.high %v3342_v6, %v3342_v6 }
 0x251   :  { %1527 = vrot.lane.b32.xlu1 %v1468_v20, %s3073_s19  ;;  %v3406_v33 = vrot.slane %v1688_v30, %v3346_v8  ;;  %1353 = vst.msk [vmem:[#allocation6 + $0x28] sm:$0x1] %vm1342_vm0, %v1688_v30  ;;  %v3411_v35 = vrot.slane %v1680_v32, %v3346_v8  ;;  %v1690_v36 = vcombine.high %v1680_v32, %v1680_v32  ;;  %1352 = vst.msk [vmem:[#allocation6 + $0x24] sm:$0x1] %vm1342_vm0, %v1680_v32 }
 0x252   :  { %v1689_v41 = vcombine.high %v1673_v37, %v1673_v37  ;;  %v3424_v42 = vrot.slane %v1673_v37, %v3346_v8  ;;  %v1687_v43 = vrot.slane %v1659_v38, %v3336_v61  ;;  %1355 = vst.msk [vmem:[#allocation6 + $0x30] sm:$0x1] %vm1342_vm0, %v1673_v37  ;;  %v1377_v47 = vrot.slane %v1363_v40, %v3336_v61 }
 0x253   :  { %1756 = vrot.lane.b32.xlu0 %v1695_v21, %s3072_s0  ;;  %v3417_v39 = vrot.slane %v1690_v36, %v3346_v8  ;;  %1354 = vst.msk [vmem:[#allocation6 + $0x2c] sm:$0x1] %vm1342_vm0, %v1690_v36  ;;  %v3446_v49 = vcombine.high %v3356_v13, %v3356_v13  ;;  %v3451_v50 = vcombine.high %v3371_v18, %v3371_v18 }
 0x254   :  { %v1691_v44 = vcombine.high %v1687_v43, %v1687_v43  ;;  %v3430_v45 = vrot.slane %v1687_v43, %v3346_v8  ;;  %v3433_v46 = vrot.slane %v1689_v41, %v3346_v8  ;;  %1356 = vst.msk [vmem:[#allocation6 + $0x34] sm:$0x1] %vm1342_vm0, %v1687_v43  ;;  %1357 = vst.msk [vmem:[#allocation6 + $0x38] sm:$0x1] %vm1342_vm0, %v1689_v41 }
 0x255   :  { %1758 = vrot.lane.b32.xlu1 %v1699_v22, %s3072_s0  ;;  %v1379_v51 = vcombine.high %v1377_v47, %v1377_v47  ;;  %v1472_v52 = vrot.slane %v3446_v49, %v3346_v8  ;;  %v3457_v53 = vrot.slane %v1377_v47, %v3336_v61  ;;  %v1476_v54 = vrot.slane %v3451_v50, %v3346_v8 }
 0x256   :  { %v3440_v48 = vrot.slane %v1691_v44, %v3346_v8  ;;  %1358 = vst.msk [vmem:[#allocation6 + $0x3c] sm:$0x1] %vm1342_vm0, %v1691_v44  ;;  %v1703_v58 = vrot.slane %v3350_v9, %v3346_v8  ;;  %v1707_v59 = vrot.slane %v3359_v15, %v3346_v8  ;;  %v1711_v60 = vrot.slane %v3353_v10, %v3346_v8 }
 0x257   :  { %2120 = vrot.lane.b32.xlu0 %v1695_v21, %s3077_s1  ;;  %v3463_v55 = vrot.slane %v1379_v51, %v3336_v61  ;;  %v1480_v56 = vrot.slane %v3457_v53, %v3346_v8  ;;  %v1715_v62 = vrot.slane %v3362_v16, %v3346_v8  ;;  %v1419_v0 = vrot.slane %v1360_v63, %v3336_v61 }
 0x258   :  { %v3501_v1 = vcombine.high %v3457_v53, %v3457_v53  ;;  %v1412_v11 = vcombine.high %v1360_v63, %v1360_v63 }
 0x259   :  { %2122 = vrot.lane.b32.xlu1 %v1699_v22, %s3077_s1  ;;  %v1484_v57 = vrot.slane %v3463_v55, %v3346_v8  ;;  %v3506_v3 = vcombine.high %v3463_v55, %v3463_v55  ;;  %v1427_v4 = vcombine.high %v1419_v0, %v1419_v0  ;;  %v3512_v6 = vrot.slane %v1419_v0, %v3336_v61 }
 0x25a   :  { %v1488_v5 = vrot.slane %v3501_v1, %v3346_v8  ;;  %v1426_v12 = vrot.slane %v1412_v11, %v3336_v61 }
 0x25b   :  { %2350 = vrot.lane.b32.xlu0 %v1464_v17, %s3072_s0  ;;  %v1492_v7 = vrot.slane %v3506_v3, %v3346_v8  ;;  %v3518_v2 = vrot.slane %v1427_v4, %v3336_v61  ;;  %v1496_v9 = vrot.slane %v3512_v6, %v3346_v8  ;;  %v3560_v15 = vcombine.high %v3512_v6, %v3512_v6 }
 0x25c   :  { %v1428_v19 = vcombine.high %v1426_v12, %v1426_v12 }
 0x25d   :  { %2352 = vrot.lane.b32.xlu1 %v1468_v20, %s3072_s0  ;;  %v1500_v10 = vrot.slane %v3518_v2, %v3346_v8 }
 0x25e   :  { %v3587_v25 = vrot.slane %v1428_v19, %v3336_v61 }
 0x25f   :  { %2580 = vrot.lane.b32.xlu0 %v1695_v21, %s3078_s2  ;;  %v3572_v21 = vrot.slane %v3560_v15, %v3346_v8 }
 0x261   :  { %2582 = vrot.lane.b32.xlu1 %v1699_v22, %s3078_s2  ;;  %v3575_v22 = vrot.slane %v1426_v12, %v3336_v61  ;;  %v3603_v61 = vrot.slane %v3587_v25, %v3346_v8 }
 0x263   :  { %2810 = vrot.lane.b32.xlu0 %v1464_v17, %s3077_s1  ;;  %v3566_v17 = vcombine.high %v3518_v2, %v3518_v2 }
 0x265   :  { %2812 = vrot.lane.b32.xlu1 %v1468_v20, %s3077_s1  ;;  %v3584_v24 = vrot.slane %v3566_v17, %v3346_v8 }
 0x267   :  { %1529 = vrot.lane.b32.xlu0 %v1472_v52, %s3073_s19 }
 0x269   :  { %1531 = vrot.lane.b32.xlu1 %v1476_v54, %s3073_s19 }
 0x26b   :  { %1533 = vrot.lane.b32.xlu0 %v1480_v56, %s3073_s19 }
 0x26d   :  { %1535 = vrot.lane.b32.xlu1 %v1484_v57, %s3073_s19 }
 0x26f   :  { %1760 = vrot.lane.b32.xlu0 %v1703_v58, %s3072_s0 }
 0x271   :  { %1762 = vrot.lane.b32.xlu1 %v1707_v59, %s3072_s0 }
 0x273   :  { %1764 = vrot.lane.b32.xlu0 %v1711_v60, %s3072_s0 }
 0x275   :  { %1766 = vrot.lane.b32.xlu1 %v1715_v62, %s3072_s0 }
 0x277   :  { %2124 = vrot.lane.b32.xlu0 %v1703_v58, %s3077_s1 }
 0x279   :  { %2126 = vrot.lane.b32.xlu1 %v1707_v59, %s3077_s1 }
 0x27b   :  { %2128 = vrot.lane.b32.xlu0 %v1711_v60, %s3077_s1 }
 0x27d   :  { %2130 = vrot.lane.b32.xlu1 %v1715_v62, %s3077_s1 }
 0x27f   :  { %2354 = vrot.lane.b32.xlu0 %v1472_v52, %s3072_s0 }
 0x281   :  { %2356 = vrot.lane.b32.xlu1 %v1476_v54, %s3072_s0 }
 0x283   :  { %2358 = vrot.lane.b32.xlu0 %v1480_v56, %s3072_s0 }
 0x285   :  { %2360 = vrot.lane.b32.xlu1 %v1484_v57, %s3072_s0 }
 0x287   :  { %2584 = vrot.lane.b32.xlu0 %v1703_v58, %s3078_s2 }
 0x289   :  { %2586 = vrot.lane.b32.xlu1 %v1707_v59, %s3078_s2 }
 0x28b   :  { %2588 = vrot.lane.b32.xlu0 %v1711_v60, %s3078_s2 }
 0x28d   :  { %2590 = vrot.lane.b32.xlu1 %v1715_v62, %s3078_s2 }
 0x28f   :  { %2814 = vrot.lane.b32.xlu0 %v1472_v52, %s3077_s1 }
 0x291   :  { %2816 = vrot.lane.b32.xlu1 %v1476_v54, %s3077_s1 }
 0x293   :  { %2818 = vrot.lane.b32.xlu0 %v1480_v56, %s3077_s1 }
 0x295   :  { %2820 = vrot.lane.b32.xlu1 %v1484_v57, %s3077_s1 }
 0x297   :  { %1537 = vrot.lane.b32.xlu0 %v1488_v5, %s3073_s19 }
 0x299   :  { %1539 = vrot.lane.b32.xlu1 %v1492_v7, %s3073_s19 }
 0x29b   :  { %1541 = vrot.lane.b32.xlu0 %v1496_v9, %s3073_s19 }
 0x29d   :  { %1543 = vrot.lane.b32.xlu1 %v1500_v10, %s3073_s19 }
 0x29f   :  { %1768 = vrot.lane.b32.xlu0 %v3391_v26, %s3072_s0 }
 0x2a1   :  { %1770 = vrot.lane.b32.xlu1 %v3394_v27, %s3072_s0 }
 0x2a3   :  { %1772 = vrot.lane.b32.xlu0 %v3397_v28, %s3072_s0 }
 0x2a5   :  { %1774 = vrot.lane.b32.xlu1 %v3411_v35, %s3072_s0 }
 0x2a7   :  { %2132 = vrot.lane.b32.xlu0 %v3391_v26, %s3077_s1 }
 0x2a9   :  { %2134 = vrot.lane.b32.xlu1 %v3394_v27, %s3077_s1 }
 0x2ab   :  { %2136 = vrot.lane.b32.xlu0 %v3397_v28, %s3077_s1 }
 0x2ad   :  { %2138 = vrot.lane.b32.xlu1 %v3411_v35, %s3077_s1 }
 0x2af   :  { %2362 = vrot.lane.b32.xlu0 %v1488_v5, %s3072_s0 }
 0x2b1   :  { %2364 = vrot.lane.b32.xlu1 %v1492_v7, %s3072_s0 }
 0x2b3   :  { %2366 = vrot.lane.b32.xlu0 %v1496_v9, %s3072_s0 }
 0x2b5   :  { %2368 = vrot.lane.b32.xlu1 %v1500_v10, %s3072_s0 }
 0x2b7   :  { %2592 = vrot.lane.b32.xlu0 %v3391_v26, %s3078_s2 }
 0x2b9   :  { %2594 = vrot.lane.b32.xlu1 %v3394_v27, %s3078_s2 }
 0x2bb   :  { %2596 = vrot.lane.b32.xlu0 %v3397_v28, %s3078_s2 }
 0x2bd   :  { %2598 = vrot.lane.b32.xlu1 %v3411_v35, %s3078_s2 }
 0x2bf   :  { %2822 = vrot.lane.b32.xlu0 %v1488_v5, %s3077_s1 }
 0x2c1   :  { %v1526_v14 = vpop.permute.xlu0 %1525  ;;  %2824 = vrot.lane.b32.xlu1 %v1492_v7, %s3077_s1 }
 0x2c2   :  { %1574 = vst.msk [vmem:[#allocation6] sm:$0x1] %vm1573_vm1, %v1526_v14 }
 0x2c3   :  { %v1528_v16 = vpop.permute.xlu1 %1527  ;;  %2826 = vrot.lane.b32.xlu0 %v1496_v9, %s3077_s1 }
 0x2c4   :  { %1575 = vst.msk [vmem:[#allocation6 + $0x4] sm:$0x1] %vm1573_vm1, %v1528_v16 }
 0x2c5   :  { %v1757_v20 = vpop.permute.xlu0 %1756  ;;  %2828 = vrot.lane.b32.xlu1 %v1500_v10, %s3077_s1 }
 0x2c6   :  { %1804 = vst.msk [vmem:[#allocation6 + $0x1] sm:$0x1] %vm1342_vm0, %v1757_v20 }
 0x2c7   :  { %1938 = vst.msk [vmem:[#allocation6 + $0x1] sm:$0x1] %vm1573_vm1, %v3356_v13  ;;  %v1759_v23 = vpop.permute.xlu1 %1758  ;;  %1545 = vrot.lane.b32.xlu0 %v3572_v21, %s3073_s19  ;;  %v3596_v13 = vrot.slane %v3575_v22, %v3346_v8 }
 0x2c8   :  { %1805 = vst.msk [vmem:[#allocation6 + $0x5] sm:$0x1] %vm1342_vm0, %v1759_v23 }
 0x2c9   :  { %1939 = vst.msk [vmem:[#allocation6 + $0x5] sm:$0x1] %vm1573_vm1, %v3371_v18  ;;  %v2121_v26 = vpop.permute.xlu0 %2120  ;;  %1547 = vrot.lane.b32.xlu1 %v3584_v24, %s3073_s19 }
 0x2ca   :  { %2168 = vst.msk [vmem:[#allocation6 + $0x2] sm:$0x1] %vm1342_vm0, %v2121_v26 }
 0x2cb   :  { %v2123_v27 = vpop.permute.xlu1 %2122  ;;  %1549 = vrot.lane.b32.xlu0 %v3596_v13, %s3073_s19 }
 0x2cc   :  { %2169 = vst.msk [vmem:[#allocation6 + $0x6] sm:$0x1] %vm1342_vm0, %v2123_v27 }
 0x2cd   :  { %v2351_v18 = vpop.permute.xlu0 %2350  ;;  %1551 = vrot.lane.b32.xlu1 %v3603_v61, %s3073_s19 }
 0x2ce   :  { %2398 = vst.msk [vmem:[#allocation6 + $0x2] sm:$0x1] %vm1573_vm1, %v2351_v18 }
 0x2cf   :  { %v2353_v28 = vpop.permute.xlu1 %2352  ;;  %1776 = vrot.lane.b32.xlu0 %v3406_v33, %s3072_s0 }
 0x2d0   :  { %2399 = vst.msk [vmem:[#allocation6 + $0x6] sm:$0x1] %vm1573_vm1, %v2353_v28 }
 0x2d1   :  { %v2581_v29 = vpop.permute.xlu0 %2580  ;;  %1778 = vrot.lane.b32.xlu1 %v3417_v39, %s3072_s0 }
 0x2d2   :  { %2628 = vst.msk [vmem:[#allocation6 + $0x3] sm:$0x1] %vm1342_vm0, %v2581_v29 }
 0x2d3   :  { %v2583_v30 = vpop.permute.xlu1 %2582  ;;  %1780 = vrot.lane.b32.xlu0 %v3424_v42, %s3072_s0 }
 0x2d4   :  { %2629 = vst.msk [vmem:[#allocation6 + $0x7] sm:$0x1] %vm1342_vm0, %v2583_v30 }
 0x2d5   :  { %v2811_v31 = vpop.permute.xlu0 %2810  ;;  %1782 = vrot.lane.b32.xlu1 %v3430_v45, %s3072_s0 }
 0x2d6   :  { %2858 = vst.msk [vmem:[#allocation6 + $0x3] sm:$0x1] %vm1573_vm1, %v2811_v31 }
 0x2d7   :  { %v2813_v32 = vpop.permute.xlu1 %2812  ;;  %2140 = vrot.lane.b32.xlu0 %v3406_v33, %s3077_s1 }
 0x2d8   :  { %2859 = vst.msk [vmem:[#allocation6 + $0x7] sm:$0x1] %vm1573_vm1, %v2813_v32 }
 0x2d9   :  { %v1530_v34 = vpop.permute.xlu0 %1529  ;;  %2142 = vrot.lane.b32.xlu1 %v3417_v39, %s3077_s1 }
 0x2da   :  { %1576 = vst.msk [vmem:[#allocation6 + $0x8] sm:$0x1] %vm1573_vm1, %v1530_v34 }
 0x2db   :  { %v1532_v35 = vpop.permute.xlu1 %1531  ;;  %2144 = vrot.lane.b32.xlu0 %v3424_v42, %s3077_s1 }
 0x2dc   :  { %1577 = vst.msk [vmem:[#allocation6 + $0xc] sm:$0x1] %vm1573_vm1, %v1532_v35 }
 0x2dd   :  { %v1534_v36 = vpop.permute.xlu0 %1533  ;;  %2146 = vrot.lane.b32.xlu1 %v3430_v45, %s3077_s1 }
 0x2de   :  { %1578 = vst.msk [vmem:[#allocation6 + $0x10] sm:$0x1] %vm1573_vm1, %v1534_v36 }
 0x2df   :  { %v1536_v37 = vpop.permute.xlu1 %1535  ;;  %2370 = vrot.lane.b32.xlu0 %v3572_v21, %s3072_s0 }
 0x2e0   :  { %1579 = vst.msk [vmem:[#allocation6 + $0x14] sm:$0x1] %vm1573_vm1, %v1536_v37 }
 0x2e1   :  { %v1761_v38 = vpop.permute.xlu0 %1760  ;;  %2372 = vrot.lane.b32.xlu1 %v3584_v24, %s3072_s0 }
 0x2e2   :  { %1806 = vst.msk [vmem:[#allocation6 + $0x9] sm:$0x1] %vm1342_vm0, %v1761_v38 }
 0x2e3   :  { %1940 = vst.msk [vmem:[#allocation6 + $0x9] sm:$0x1] %vm1573_vm1, %v3446_v49  ;;  %v1763_v40 = vpop.permute.xlu1 %1762  ;;  %2374 = vrot.lane.b32.xlu0 %v3596_v13, %s3072_s0 }
 0x2e4   :  { %1807 = vst.msk [vmem:[#allocation6 + $0xd] sm:$0x1] %vm1342_vm0, %v1763_v40 }
 0x2e5   :  { %1941 = vst.msk [vmem:[#allocation6 + $0xd] sm:$0x1] %vm1573_vm1, %v3451_v50  ;;  %v1765_v41 = vpop.permute.xlu0 %1764  ;;  %2376 = vrot.lane.b32.xlu1 %v3603_v61, %s3072_s0  ;;  %v3679_v50 = vcombine.high %v3587_v25, %v3587_v25 }
 0x2e6   :  { %1808 = vst.msk [vmem:[#allocation6 + $0x11] sm:$0x1] %vm1342_vm0, %v1765_v41 }
 0x2e7   :  { %1942 = vst.msk [vmem:[#allocation6 + $0x11] sm:$0x1] %vm1573_vm1, %v3457_v53  ;;  %2600 = vrot.lane.b32.xlu0 %v3406_v33, %s3078_s2  ;;  %v1767_v43 = vpop.permute.xlu1 %1766  ;;  %v1524_v54 = vrot.slane %v3679_v50, %v3346_v8 }
 0x2e8   :  { %1809 = vst.msk [vmem:[#allocation6 + $0x15] sm:$0x1] %vm1342_vm0, %v1767_v43 }
 0x2e9   :  { %1943 = vst.msk [vmem:[#allocation6 + $0x15] sm:$0x1] %vm1573_vm1, %v3463_v55  ;;  %v2125_v44 = vpop.permute.xlu0 %2124  ;;  %2602 = vrot.lane.b32.xlu1 %v3417_v39, %s3078_s2 }
 0x2ea   :  { %2170 = vst.msk [vmem:[#allocation6 + $0xa] sm:$0x1] %vm1342_vm0, %v2125_v44 }
 0x2eb   :  { %2604 = vrot.lane.b32.xlu0 %v3424_v42, %s3078_s2  ;;  %v2127_v47 = vpop.permute.xlu1 %2126  ;;  %v3672_v42 = vcombine.high %v3575_v22, %v3575_v22 }
 0x2ec   :  { %2171 = vst.msk [vmem:[#allocation6 + $0xe] sm:$0x1] %vm1342_vm0, %v2127_v47 }
 0x2ed   :  { %v2129_v49 = vpop.permute.xlu0 %2128  ;;  %2606 = vrot.lane.b32.xlu1 %v3430_v45, %s3078_s2  ;;  %v1520_v52 = vrot.slane %v3672_v42, %v3346_v8 }
 0x2ee   :  { %2172 = vst.msk [vmem:[#allocation6 + $0x12] sm:$0x1] %vm1342_vm0, %v2129_v49 }
 0x2ef   :  { %2830 = vrot.lane.b32.xlu0 %v3572_v21, %s3077_s1  ;;  %v2131_v33 = vpop.permute.xlu1 %2130 }
 0x2f0   :  { %2173 = vst.msk [vmem:[#allocation6 + $0x16] sm:$0x1] %vm1342_vm0, %v2131_v33 }
 0x2f1   :  { %v2355_v39 = vpop.permute.xlu0 %2354  ;;  %2832 = vrot.lane.b32.xlu1 %v3584_v24, %s3077_s1 }
 0x2f2   :  { %2400 = vst.msk [vmem:[#allocation6 + $0xa] sm:$0x1] %vm1573_vm1, %v2355_v39 }
 0x2f3   :  { %2834 = vrot.lane.b32.xlu0 %v3596_v13, %s3077_s1  ;;  %v2357_v45 = vpop.permute.xlu1 %2356 }
 0x2f4   :  { %2401 = vst.msk [vmem:[#allocation6 + $0xe] sm:$0x1] %vm1573_vm1, %v2357_v45 }
 0x2f5   :  { %v2359_v51 = vpop.permute.xlu0 %2358  ;;  %2836 = vrot.lane.b32.xlu1 %v3603_v61, %s3077_s1 }
 0x2f6   :  { %2402 = vst.msk [vmem:[#allocation6 + $0x12] sm:$0x1] %vm1573_vm1, %v2359_v51 }
 0x2f7   :  { %1553 = vrot.lane.b32.xlu0 %v1520_v52, %s3073_s19  ;;  %v2361_v53 = vpop.permute.xlu1 %2360 }
 0x2f8   :  { %2403 = vst.msk [vmem:[#allocation6 + $0x16] sm:$0x1] %vm1573_vm1, %v2361_v53 }
 0x2f9   :  { %v2585_v55 = vpop.permute.xlu0 %2584  ;;  %1555 = vrot.lane.b32.xlu1 %v1524_v54, %s3073_s19 }
 0x2fa   :  { %2630 = vst.msk [vmem:[#allocation6 + $0xb] sm:$0x1] %vm1342_vm0, %v2585_v55 }
 0x2fb   :  { %1784 = vrot.lane.b32.xlu0 %v3433_v46, %s3072_s0  ;;  %v2587_v56 = vpop.permute.xlu1 %2586 }
 0x2fc   :  { %2631 = vst.msk [vmem:[#allocation6 + $0xf] sm:$0x1] %vm1342_vm0, %v2587_v56 }
 0x2fd   :  { %v2589_v57 = vpop.permute.xlu0 %2588  ;;  %1786 = vrot.lane.b32.xlu1 %v3440_v48, %s3072_s0 }
 0x2fe   :  { %2632 = vst.msk [vmem:[#allocation6 + $0x13] sm:$0x1] %vm1342_vm0, %v2589_v57 }
 0x2ff   :  { %2148 = vrot.lane.b32.xlu0 %v3433_v46, %s3077_s1  ;;  %v2591_v8 = vpop.permute.xlu1 %2590 }
 0x300   :  { %2633 = vst.msk [vmem:[#allocation6 + $0x17] sm:$0x1] %vm1342_vm0, %v2591_v8 }
 0x301   :  { %v2815_v58 = vpop.permute.xlu0 %2814  ;;  %2150 = vrot.lane.b32.xlu1 %v3440_v48, %s3077_s1 }
 0x302   :  { %2860 = vst.msk [vmem:[#allocation6 + $0xb] sm:$0x1] %vm1573_vm1, %v2815_v58 }
 0x303   :  { %2378 = vrot.lane.b32.xlu0 %v1520_v52, %s3072_s0  ;;  %v2817_v59 = vpop.permute.xlu1 %2816 }
 0x304   :  { %2861 = vst.msk [vmem:[#allocation6 + $0xf] sm:$0x1] %vm1573_vm1, %v2817_v59 }
 0x305   :  { %v2819_v60 = vpop.permute.xlu0 %2818  ;;  %2380 = vrot.lane.b32.xlu1 %v1524_v54, %s3072_s0 }
 0x306   :  { %2862 = vst.msk [vmem:[#allocation6 + $0x13] sm:$0x1] %vm1573_vm1, %v2819_v60 }
 0x307   :  { %2608 = vrot.lane.b32.xlu0 %v3433_v46, %s3078_s2  ;;  %v2821_v62 = vpop.permute.xlu1 %2820 }
 0x308   :  { %2863 = vst.msk [vmem:[#allocation6 + $0x17] sm:$0x1] %vm1573_vm1, %v2821_v62 }
 0x309   :  { %v1538_v63 = vpop.permute.xlu0 %1537  ;;  %2610 = vrot.lane.b32.xlu1 %v3440_v48, %s3078_s2 }
 0x30a   :  { %1580 = vst.msk [vmem:[#allocation6 + $0x18] sm:$0x1] %vm1573_vm1, %v1538_v63 }
 0x30b   :  { %2838 = vrot.lane.b32.xlu0 %v1520_v52, %s3077_s1  ;;  %v1540_v0 = vpop.permute.xlu1 %1539 }
 0x30c   :  { %1581 = vst.msk [vmem:[#allocation6 + $0x1c] sm:$0x1] %vm1573_vm1, %v1540_v0 }
 0x30d   :  { %v1542_v4 = vpop.permute.xlu0 %1541  ;;  %2840 = vrot.lane.b32.xlu1 %v1524_v54, %s3077_s1 }
 0x30e   :  { %1582 = vst.msk [vmem:[#allocation6 + $0x20] sm:$0x1] %vm1573_vm1, %v1542_v4 }
 0x30f   :  { %v1544_v46 = vpop.permute.xlu1 %1543 }
 0x310   :  { %1583 = vst.msk [vmem:[#allocation6 + $0x24] sm:$0x1] %vm1573_vm1, %v1544_v46 }
 0x311   :  { %v1769_v5 = vpop.permute.xlu0 %1768 }
 0x312   :  { %1810 = vst.msk [vmem:[#allocation6 + $0x19] sm:$0x1] %vm1342_vm0, %v1769_v5 }
 0x313   :  { %1944 = vst.msk [vmem:[#allocation6 + $0x19] sm:$0x1] %vm1573_vm1, %v3501_v1  ;;  %v1771_v48 = vpop.permute.xlu1 %1770 }
 0x314   :  { %1811 = vst.msk [vmem:[#allocation6 + $0x1d] sm:$0x1] %vm1342_vm0, %v1771_v48 }
 0x315   :  { %1945 = vst.msk [vmem:[#allocation6 + $0x1d] sm:$0x1] %vm1573_vm1, %v3506_v3  ;;  %v1773_v7 = vpop.permute.xlu0 %1772 }
 0x316   :  { %1812 = vst.msk [vmem:[#allocation6 + $0x21] sm:$0x1] %vm1342_vm0, %v1773_v7 }
 0x317   :  { %1946 = vst.msk [vmem:[#allocation6 + $0x21] sm:$0x1] %vm1573_vm1, %v3512_v6  ;;  %v1775_v9 = vpop.permute.xlu1 %1774 }
 0x318   :  { %1813 = vst.msk [vmem:[#allocation6 + $0x25] sm:$0x1] %vm1342_vm0, %v1775_v9 }
 0x319   :  { %1947 = vst.msk [vmem:[#allocation6 + $0x25] sm:$0x1] %vm1573_vm1, %v3518_v2  ;;  %v2133_v10 = vpop.permute.xlu0 %2132 }
 0x31a   :  { %2174 = vst.msk [vmem:[#allocation6 + $0x1a] sm:$0x1] %vm1342_vm0, %v2133_v10 }
 0x31b   :  { %v2135_v1 = vpop.permute.xlu1 %2134 }
 0x31c   :  { %2175 = vst.msk [vmem:[#allocation6 + $0x1e] sm:$0x1] %vm1342_vm0, %v2135_v1 }
 0x31d   :  { %v2137_v11 = vpop.permute.xlu0 %2136 }
 0x31e   :  { %2176 = vst.msk [vmem:[#allocation6 + $0x22] sm:$0x1] %vm1342_vm0, %v2137_v11 }
 0x31f   :  { %v2139_v3 = vpop.permute.xlu1 %2138 }
 0x320   :  { %2177 = vst.msk [vmem:[#allocation6 + $0x26] sm:$0x1] %vm1342_vm0, %v2139_v3 }
 0x321   :  { %v2363_v12 = vpop.permute.xlu0 %2362 }
 0x322   :  { %2404 = vst.msk [vmem:[#allocation6 + $0x1a] sm:$0x1] %vm1573_vm1, %v2363_v12 }
 0x323   :  { %v2365_v6 = vpop.permute.xlu1 %2364 }
 0x324   :  { %2405 = vst.msk [vmem:[#allocation6 + $0x1e] sm:$0x1] %vm1573_vm1, %v2365_v6 }
 0x325   :  { %v2367_v14 = vpop.permute.xlu0 %2366 }
 0x326   :  { %2406 = vst.msk [vmem:[#allocation6 + $0x22] sm:$0x1] %vm1573_vm1, %v2367_v14 }
 0x327   :  { %v2369_v2 = vpop.permute.xlu1 %2368 }
 0x328   :  { %2407 = vst.msk [vmem:[#allocation6 + $0x26] sm:$0x1] %vm1573_vm1, %v2369_v2 }
 0x329   :  { %v2593_v16 = vpop.permute.xlu0 %2592 }
 0x32a   :  { %2634 = vst.msk [vmem:[#allocation6 + $0x1b] sm:$0x1] %vm1342_vm0, %v2593_v16 }
 0x32b   :  { %v2595_v19 = vpop.permute.xlu1 %2594 }
 0x32c   :  { %2635 = vst.msk [vmem:[#allocation6 + $0x1f] sm:$0x1] %vm1342_vm0, %v2595_v19 }
 0x32d   :  { %v2597_v20 = vpop.permute.xlu0 %2596 }
 0x32e   :  { %2636 = vst.msk [vmem:[#allocation6 + $0x23] sm:$0x1] %vm1342_vm0, %v2597_v20 }
 0x32f   :  { %v2599_v21 = vpop.permute.xlu1 %2598 }
 0x330   :  { %2637 = vst.msk [vmem:[#allocation6 + $0x27] sm:$0x1] %vm1342_vm0, %v2599_v21 }
 0x331   :  { %v2823_v23 = vpop.permute.xlu0 %2822 }
 0x332   :  { %2864 = vst.msk [vmem:[#allocation6 + $0x1b] sm:$0x1] %vm1573_vm1, %v2823_v23 }
 0x333   :  { %v2825_v24 = vpop.permute.xlu1 %2824 }
 0x334   :  { %2865 = vst.msk [vmem:[#allocation6 + $0x1f] sm:$0x1] %vm1573_vm1, %v2825_v24 }
 0x335   :  { %v2827_v26 = vpop.permute.xlu0 %2826 }
 0x336   :  { %2866 = vst.msk [vmem:[#allocation6 + $0x23] sm:$0x1] %vm1573_vm1, %v2827_v26 }
 0x337   :  { %v2829_v13 = vpop.permute.xlu1 %2828 }
 0x338   :  { %2867 = vst.msk [vmem:[#allocation6 + $0x27] sm:$0x1] %vm1573_vm1, %v2829_v13 }
 0x339   :  { %v1546_v27 = vpop.permute.xlu0 %1545 }
 0x33a   :  { %1584 = vst.msk [vmem:[#allocation6 + $0x28] sm:$0x1] %vm1573_vm1, %v1546_v27 }
 0x33b   :  { %v1548_v61 = vpop.permute.xlu1 %1547 }
 0x33c   :  { %1585 = vst.msk [vmem:[#allocation6 + $0x2c] sm:$0x1] %vm1573_vm1, %v1548_v61 }
 0x33d   :  { %v1550_v18 = vpop.permute.xlu0 %1549 }
 0x33e   :  { %1586 = vst.msk [vmem:[#allocation6 + $0x30] sm:$0x1] %vm1573_vm1, %v1550_v18 }
 0x33f   :  { %v1552_v28 = vpop.permute.xlu1 %1551 }
 0x340   :  { %1587 = vst.msk [vmem:[#allocation6 + $0x34] sm:$0x1] %vm1573_vm1, %v1552_v28 }
 0x341   :  { %v1777_v29 = vpop.permute.xlu0 %1776 }
 0x342   :  { %1814 = vst.msk [vmem:[#allocation6 + $0x29] sm:$0x1] %vm1342_vm0, %v1777_v29 }
 0x343   :  { %1948 = vst.msk [vmem:[#allocation6 + $0x29] sm:$0x1] %vm1573_vm1, %v3560_v15  ;;  %v1779_v30 = vpop.permute.xlu1 %1778 }
 0x344   :  { %1815 = vst.msk [vmem:[#allocation6 + $0x2d] sm:$0x1] %vm1342_vm0, %v1779_v30 }
 0x345   :  { %1949 = vst.msk [vmem:[#allocation6 + $0x2d] sm:$0x1] %vm1573_vm1, %v3566_v17  ;;  %v1781_v31 = vpop.permute.xlu0 %1780 }
 0x346   :  { %1816 = vst.msk [vmem:[#allocation6 + $0x31] sm:$0x1] %vm1342_vm0, %v1781_v31 }
 0x347   :  { %1950 = vst.msk [vmem:[#allocation6 + $0x31] sm:$0x1] %vm1573_vm1, %v3575_v22  ;;  %v1783_v32 = vpop.permute.xlu1 %1782 }
 0x348   :  { %1817 = vst.msk [vmem:[#allocation6 + $0x35] sm:$0x1] %vm1342_vm0, %v1783_v32 }
 0x349   :  { %1951 = vst.msk [vmem:[#allocation6 + $0x35] sm:$0x1] %vm1573_vm1, %v3587_v25  ;;  %v2141_v34 = vpop.permute.xlu0 %2140 }
 0x34a   :  { %2178 = vst.msk [vmem:[#allocation6 + $0x2a] sm:$0x1] %vm1342_vm0, %v2141_v34 }
 0x34b   :  { %v2143_v15 = vpop.permute.xlu1 %2142 }
 0x34c   :  { %2179 = vst.msk [vmem:[#allocation6 + $0x2e] sm:$0x1] %vm1342_vm0, %v2143_v15 }
 0x34d   :  { %v2145_v35 = vpop.permute.xlu0 %2144 }
 0x34e   :  { %2180 = vst.msk [vmem:[#allocation6 + $0x32] sm:$0x1] %vm1342_vm0, %v2145_v35 }
 0x34f   :  { %v2147_v17 = vpop.permute.xlu1 %2146 }
 0x350   :  { %2181 = vst.msk [vmem:[#allocation6 + $0x36] sm:$0x1] %vm1342_vm0, %v2147_v17 }
 0x351   :  { %v2371_v36 = vpop.permute.xlu0 %2370 }
 0x352   :  { %2408 = vst.msk [vmem:[#allocation6 + $0x2a] sm:$0x1] %vm1573_vm1, %v2371_v36 }
 0x353   :  { %v2373_v22 = vpop.permute.xlu1 %2372 }
 0x354   :  { %2409 = vst.msk [vmem:[#allocation6 + $0x2e] sm:$0x1] %vm1573_vm1, %v2373_v22 }
 0x355   :  { %v2375_v37 = vpop.permute.xlu0 %2374 }
 0x356   :  { %2410 = vst.msk [vmem:[#allocation6 + $0x32] sm:$0x1] %vm1573_vm1, %v2375_v37 }
 0x357   :  { %v2377_v25 = vpop.permute.xlu1 %2376 }
 0x358   :  { %2411 = vst.msk [vmem:[#allocation6 + $0x36] sm:$0x1] %vm1573_vm1, %v2377_v25 }
 0x359   :  { %v2601_v38 = vpop.permute.xlu0 %2600 }
 0x35a   :  { %2638 = vst.msk [vmem:[#allocation6 + $0x2b] sm:$0x1] %vm1342_vm0, %v2601_v38 }
 0x35b   :  { %v2603_v40 = vpop.permute.xlu1 %2602 }
 0x35c   :  { %2639 = vst.msk [vmem:[#allocation6 + $0x2f] sm:$0x1] %vm1342_vm0, %v2603_v40 }
 0x35d   :  { %v2605_v41 = vpop.permute.xlu0 %2604 }
 0x35e   :  { %2640 = vst.msk [vmem:[#allocation6 + $0x33] sm:$0x1] %vm1342_vm0, %v2605_v41 }
 0x35f   :  { %v2607_v43 = vpop.permute.xlu1 %2606 }
 0x360   :  { %2641 = vst.msk [vmem:[#allocation6 + $0x37] sm:$0x1] %vm1342_vm0, %v2607_v43 }
 0x361   :  { %v2831_v44 = vpop.permute.xlu0 %2830 }
 0x362   :  { %2868 = vst.msk [vmem:[#allocation6 + $0x2b] sm:$0x1] %vm1573_vm1, %v2831_v44 }
 0x363   :  { %v2833_v47 = vpop.permute.xlu1 %2832 }
 0x364   :  { %2869 = vst.msk [vmem:[#allocation6 + $0x2f] sm:$0x1] %vm1573_vm1, %v2833_v47 }
 0x365   :  { %v2835_v49 = vpop.permute.xlu0 %2834 }
 0x366   :  { %2870 = vst.msk [vmem:[#allocation6 + $0x33] sm:$0x1] %vm1573_vm1, %v2835_v49 }
 0x367   :  { %v2837_v33 = vpop.permute.xlu1 %2836 }
 0x368   :  { %2871 = vst.msk [vmem:[#allocation6 + $0x37] sm:$0x1] %vm1573_vm1, %v2837_v33 }
 0x369   :  { %v1554_v39 = vpop.permute.xlu0 %1553 }
 0x36a   :  { %1588 = vst.msk [vmem:[#allocation6 + $0x38] sm:$0x1] %vm1573_vm1, %v1554_v39 }
 0x36b   :  { %v1556_v45 = vpop.permute.xlu1 %1555 }
 0x36c   :  { %1589 = vst.msk [vmem:[#allocation6 + $0x3c] sm:$0x1] %vm1573_vm1, %v1556_v45 }
 0x36d   :  { %v1785_v51 = vpop.permute.xlu0 %1784 }
 0x36e   :  { %1818 = vst.msk [vmem:[#allocation6 + $0x39] sm:$0x1] %vm1342_vm0, %v1785_v51 }
 0x36f   :  { %1952 = vst.msk [vmem:[#allocation6 + $0x39] sm:$0x1] %vm1573_vm1, %v3672_v42  ;;  %v1787_v52 = vpop.permute.xlu1 %1786 }
 0x370   :  { %1819 = vst.msk [vmem:[#allocation6 + $0x3d] sm:$0x1] %vm1342_vm0, %v1787_v52 }
 0x371   :  { %1953 = vst.msk [vmem:[#allocation6 + $0x3d] sm:$0x1] %vm1573_vm1, %v3679_v50  ;;  %v2149_v53 = vpop.permute.xlu0 %2148 }
 0x372   :  { %2182 = vst.msk [vmem:[#allocation6 + $0x3a] sm:$0x1] %vm1342_vm0, %v2149_v53 }
 0x373   :  { %v2151_v54 = vpop.permute.xlu1 %2150 }
 0x374   :  { %2183 = vst.msk [vmem:[#allocation6 + $0x3e] sm:$0x1] %vm1342_vm0, %v2151_v54 }
 0x375   :  { %v2379_v55 = vpop.permute.xlu0 %2378 }
 0x376   :  { %2412 = vst.msk [vmem:[#allocation6 + $0x3a] sm:$0x1] %vm1573_vm1, %v2379_v55 }
 0x377   :  { %v2381_v56 = vpop.permute.xlu1 %2380 }
 0x378   :  { %2413 = vst.msk [vmem:[#allocation6 + $0x3e] sm:$0x1] %vm1573_vm1, %v2381_v56 }
 0x379   :  { %v2609_v57 = vpop.permute.xlu0 %2608 }
 0x37a   :  { %2642 = vst.msk [vmem:[#allocation6 + $0x3b] sm:$0x1] %vm1342_vm0, %v2609_v57 }
 0x37b   :  { %v2611_v42 = vpop.permute.xlu1 %2610 }
 0x37c   :  { %2643 = vst.msk [vmem:[#allocation6 + $0x3f] sm:$0x1] %vm1342_vm0, %v2611_v42 }
 0x37d   :  { %v2839_v50 = vpop.permute.xlu0 %2838 }
 0x37e   :  { %2872 = vst.msk [vmem:[#allocation6 + $0x3b] sm:$0x1] %vm1573_vm1, %v2839_v50 }
 0x37f   :  { %v2841_v8 = vpop.permute.xlu1 %2840 }
 0x380   :  { %2873 = vst.msk [vmem:[#allocation6 + $0x3f] sm:$0x1] %vm1573_vm1, %v2841_v8 }
 0x381   :  { %3059 = shalt.err (!%p3056_p4)
}
 0x382   :  { %s3080_s7 = smov 64   ;;  %s3081_s8 = smov 4  }
 0x383   :  { %2885 = dma.vmem_to_hbm [thread:$0]  %s2880_s29, 1024, %s3805_s6, [#allocation7], %s3080_s7, %s3080_s7, %s3081_s8  }
 0x384   :  { %3068 = dma.done.wait [#allocation7], 1024  }
 0x385   :  { %3069 = vsyncadd [#allocation7], 4294966272 }
 0x386   :  { %2889 = vsyncpa [#allocation7], 1 }

</bundles_post_ra>
